<compile_context>
chip_gen: v7x
topology: tpu7x:2x2x1
jax: 0.10.0
libtpu: 0.0.40
codegen_flags: <defaults>
</compile_context>

<pallas_src>
import math
import functools

import jax
import jax.numpy as jnp
from jax.experimental import pallas as pl
from jax.experimental.pallas import tpu as pltpu


# ---------------------------------------------------------------------------
# Kernel
# ---------------------------------------------------------------------------
def _mha_kernel(q_ref, k_ref, v_ref, wqkv_ref, bqkv_ref, wo_ref, bo_ref,
                out_ref, *rest, num_heads, scaling, compute_dtype,
                need_weights):
    if need_weights:
        attw_ref, ctx_scr = rest
    else:
        (ctx_scr,) = rest

    Bb, Tt, E = q_ref.shape
    S = k_ref.shape[1]
    H = num_heads
    d = E // H
    cd = compute_dtype

    # Flatten the batch block into the matmul M dimension; cast MXU operands to
    # the compute dtype (bf16 by default -> single-pass MXU, half the VMEM).
    qf = q_ref[...].reshape(Bb * Tt, E).astype(cd)
    kf = k_ref[...].reshape(Bb * S, E).astype(cd)
    vf = v_ref[...].reshape(Bb * S, E).astype(cd)

    # Full-width (M,E)@(E,E) projections (fills the MXU N/K dimensions instead
    # of H thin d-wide matmuls); f32 accumulation, f32 bias, f32 scaling.
    q_p = (jnp.dot(qf, wqkv_ref[0].astype(cd),
                   preferred_element_type=jnp.float32) + bqkv_ref[0]) * scaling
    k_p = jnp.dot(kf, wqkv_ref[1].astype(cd),
                  preferred_element_type=jnp.float32) + bqkv_ref[1]
    v_p = jnp.dot(vf, wqkv_ref[2].astype(cd),
                  preferred_element_type=jnp.float32) + bqkv_ref[2]

    # One cast per projection; per-head views below are static lane slices.
    q3 = q_p.astype(cd).reshape(Bb, Tt, E)
    k3 = k_p.astype(cd).reshape(Bb, S, E)
    v3 = v_p.astype(cd).reshape(Bb, S, E)

    inv_h = 1.0 / H
    # Static head loop; the large accumulators live in VMEM (ctx_scr / the
    # output refs), so per-head intermediates do not pile up in the vreg file.
    for h in range(H):
        lo = h * d
        qh = q3[:, :, lo:lo + d]
        kh = k3[:, :, lo:lo + d]
        vh = v3[:, :, lo:lo + d]

        # Scores: canonical batched contraction over d (batch axis = batch blk).
        s = jnp.einsum('btd,bsd->bts', qh, kh,
                       preferred_element_type=jnp.float32)       # (Bb,Tt,S) f32
        s = s - jnp.max(s, axis=-1, keepdims=True)
        e = jnp.exp(s)
        # Exact normalization (rows sum to 1 — PyTorch parity).  The reciprocal
        # acts only on a (Bb,Tt,1) column, so its cost is negligible.
        p = e * (1.0 / jnp.sum(e, axis=-1, keepdims=True))

        if need_weights:
            if h == 0:
                attw_ref[...] = (p * inv_h).astype(attw_ref.dtype)
            else:
                attw_ref[...] = attw_ref[...] + (p * inv_h).astype(attw_ref.dtype)

        ctx = jnp.einsum('bts,bsd->btd', p.astype(cd), vh,
                         preferred_element_type=jnp.float32)     # (Bb,Tt,d)
        ctx_scr[:, :, lo:lo + d] = ctx.astype(cd)

    # Single full-width output projection (M,E)@(E,E) instead of H (M,d)@(d,E).
    out = jnp.dot(ctx_scr[...].reshape(Bb * Tt, E), wo_ref[...].astype(cd),
                  preferred_element_type=jnp.float32) + bo_ref[...]
    out_ref[...] = out.reshape(Bb, Tt, E).astype(out_ref.dtype)


# ---------------------------------------------------------------------------
# VMEM-aware tiling
# ---------------------------------------------------------------------------
def _tpu_vmem_capacity_bytes():
    try:
        return int(pltpu.get_tpu_info().vmem_capacity_bytes)
    except Exception:
        return 64 * 1024 * 1024   # conservative fallback (v7x per-TC VMEM)


def _valid_block_t(T):
    """Legal T tiles: multiples of 8 that divide T, plus T itself (descending)."""
    vals = {T}
    for v in range(8, T, 8):
        if T % v == 0:
            vals.add(v)
    return sorted(vals, reverse=True)


def _divisors_desc(n):
    return sorted({d for d in range(1, n + 1) if n % d == 0}, reverse=True)


def _vmem_bytes_estimate(bb, bt, S, E, need_w, cd_bytes):
    """Rough per-grid-step VMEM budget (double-buffered pipeline + scratch +
    in-kernel intermediates)."""
    f32 = 4
    q_blk = bb * bt * E * f32
    kv_blk = bb * S * E * f32
    out_blk = bb * bt * E * f32
    attw_blk = bb * bt * S * f32 if need_w else 0
    w_bytes = 4 * E * E * cd_bytes + 8 * E * f32
    pipelined = 2 * (q_blk + 2 * kv_blk + out_blk + attw_blk + w_bytes)
    scratch = bb * bt * E * cd_bytes
    interm = (3 * bb * bt * S * f32
              + (bb * bt * E + 2 * bb * S * E) * (f32 + cd_bytes))
    return pipelined + scratch + interm


def _pick_blocks(B, T, S, E, need_w, cd_bytes, budget, target_m, want_two_steps):
    bt_opts = _valid_block_t(T)
    bb_opts = _divisors_desc(B)

    bt = bt_opts[0]   # start at full T
    bb = next((b for b in bb_opts if b * bt <= max(target_m, bt)), 1)

    def fits(bb_, bt_):
        return _vmem_bytes_estimate(bb_, bt_, S, E, need_w, cd_bytes) <= budget

    # Shrink the batch block first (it also caps the K/V blocks), then T tiles.
    while not fits(bb, bt):
        smaller_bb = [b for b in bb_opts if b < bb]
        smaller_bt = [t for t in bt_opts if t < bt]
        if smaller_bb:
            bb = smaller_bb[0]
        elif smaller_bt:
            bt = smaller_bt[0]
        else:
            break   # nothing left to shrink; let the compiler have the last word

    # Give both v7x TensorCores work when the grid would otherwise be 1 step.
    if want_two_steps and (B // bb) * (T // bt) < 2:
        if B > 1:
            bb = next(b for b in bb_opts if b <= B // 2)
        else:
            smaller_bt = [t for t in bt_opts if t <= T // 2]
            if smaller_bt:
                bt = smaller_bt[0]
    return bb, bt


# ---------------------------------------------------------------------------
# Wrapper
# ---------------------------------------------------------------------------
def multihead_attention_pallas(query, key, value, params, num_heads,
                               compute_dtype=jnp.bfloat16,
                               need_weights=True,
                               block_t=None, block_b=None):
    """query/key/value: [B, T, E] / [B, S, E] / [B, S, E] float32.

    Returns (attn_output [B,T,E] f32, attn_weights [B,T,S] f32 or None).
    """
    B, T, E = query.shape
    S = key.shape[1]
    H = num_heads
    d = E // H
    assert d * H == E, "embed_dim must be divisible by num_heads"
    scaling = float(d) ** -0.5

    w_in = params["in_proj_weight"]      # (3E, E)
    b_in = params["in_proj_bias"]        # (3E,)
    w_out = params["out_proj_weight"]    # (E, E)
    b_out = params["out_proj_bias"]      # (E,)

    # Pre-transpose once on the XLA side (x @ W^T == F.linear) and pre-cast the
    # matmul operands to the MXU compute dtype; biases stay f32.
    w_qkv = w_in.reshape(3, E, E).transpose(0, 2, 1).astype(compute_dtype)  # (3,E,E)
    b_qkv = b_in.reshape(3, 1, E).astype(jnp.float32)                       # (3,1,E)
    wo_t = w_out.T.astype(compute_dtype)                                    # (E,E)
    bo = b_out.reshape(1, E).astype(jnp.float32)                            # (1,E)

    # Per-generation VMEM budget / parallelism targets.
    vmem_cap = _tpu_vmem_capacity_bytes()
    vmem_limit = int(max(32 * 1024 * 1024,
                         min(vmem_cap - 16 * 1024 * 1024, 112 * 1024 * 1024)))
    small_vmem = vmem_cap <= 80 * 1024 * 1024      # v7x (2 TCs, 64 MiB) or unknown
    target_m = 256 if small_vmem else 512          # flattened MXU M-rows target
    cd_bytes = jnp.dtype(compute_dtype).itemsize

    bb, bt = _pick_blocks(B, T, S, E, need_weights, cd_bytes, vmem_limit,
                          target_m, want_two_steps=small_vmem)
    if block_t is not None:
        bt = int(block_t)
    if block_b is not None:
        bb = int(block_b)
    assert B % bb == 0
    assert T % bt == 0 and (bt % 8 == 0 or bt == T)
    grid = (B // bb, T // bt)

    kernel = functools.partial(_mha_kernel, num_heads=H, scaling=scaling,
                               compute_dtype=compute_dtype,
                               need_weights=need_weights)

    in_specs = [
        pl.BlockSpec((bb, bt, E), lambda b, t: (b, t, 0)),   # q
        pl.BlockSpec((bb, S, E), lambda b, t: (b, 0, 0)),    # k
        pl.BlockSpec((bb, S, E), lambda b, t: (b, 0, 0)),    # v
        pl.BlockSpec((3, E, E), lambda b, t: (0, 0, 0)),     # Wq^T/Wk^T/Wv^T
        pl.BlockSpec((3, 1, E), lambda b, t: (0, 0, 0)),     # bq/bk/bv
        pl.BlockSpec((E, E), lambda b, t: (0, 0)),           # Wo^T
        pl.BlockSpec((1, E), lambda b, t: (0, 0)),           # bo
    ]
    out_specs = [pl.BlockSpec((bb, bt, E), lambda b, t: (b, t, 0))]
    out_shape = [jax.ShapeDtypeStruct((B, T, E), jnp.float32)]
    if need_weights:
        out_specs.append(pl.BlockSpec((bb, bt, S), lambda b, t: (b, t, 0)))
        out_shape.append(jax.ShapeDtypeStruct((B, T, S), jnp.float32))

    grid_spec = pltpu.PrefetchScalarGridSpec(
        num_scalar_prefetch=0,
        grid=grid,
        in_specs=in_specs,
        out_specs=out_specs,
        scratch_shapes=[pltpu.VMEM((bb, bt, E), compute_dtype)],  # ctx accumulator
    )

    outs = pl.pallas_call(
        kernel,
        grid_spec=grid_spec,
        out_shape=tuple(out_shape),
        compiler_params=pltpu.CompilerParams(
            dimension_semantics=("parallel", "parallel"),
            vmem_limit_bytes=vmem_limit,
        ),
    )(query, key, value, w_qkv, b_qkv, wo_t, bo)

    if need_weights:
        attn_out, attn_w = outs
        return attn_out, attn_w
    return outs[0], None


# ---------------------------------------------------------------------------
# Params + pure-JAX reference (mirrors F.multi_head_attention_forward)
# ---------------------------------------------------------------------------
def _xavier_uniform(key, shape):
    fan_out, fan_in = shape
    bound = math.sqrt(6.0 / (fan_in + fan_out))
    return jax.random.uniform(key, shape, jnp.float32, -bound, bound)


def init_params(key, embed_dim):
    k1, k2 = jax.random.split(key)
    return {
        "in_proj_weight": _xavier_uniform(k1, (3 * embed_dim, embed_dim)),
        "in_proj_bias": jnp.zeros((3 * embed_dim,), jnp.float32),
        "out_proj_weight": _xavier_uniform(k2, (embed_dim, embed_dim)),
        "out_proj_bias": jnp.zeros((embed_dim,), jnp.float32),
    }


def reference_mha(query, key, value, params, num_heads):
    B, T, E = query.shape
    S = key.shape[1]
    d = E // num_heads
    w_in, b_in = params["in_proj_weight"], params["in_proj_bias"]
    wq, wk, wv = w_in[:E], w_in[E:2 * E], w_in[2 * E:]
    bq, bk, bv = b_in[:E], b_in[E:2 * E], b_in[2 * E:]

    qp = (query @ wq.T + bq) * (d ** -0.5)
    kp = key @ wk.T + bk
    vp = value @ wv.T + bv

    qh = qp.reshape(B, T, num_heads, d).transpose(0, 2, 1, 3)
    kh = kp.reshape(B, S, num_heads, d).transpose(0, 2, 1, 3)
    vh = vp.reshape(B, S, num_heads, d).transpose(0, 2, 1, 3)

    s = jnp.einsum("bhtd,bhsd->bhts", qh, kh)
    p = jax.nn.softmax(s, axis=-1)
    ctx = jnp.einsum("bhts,bhsd->bhtd", p, vh)
    ctx = ctx.transpose(0, 2, 1, 3).reshape(B, T, E)
    out = ctx @ params["out_proj_weight"].T + params["out_proj_bias"]
    return out, p.mean(axis=1)


# ---------------------------------------------------------------------------
# Self-test
# ---------------------------------------------------------------------------
if __name__ == "__main__":
    # Make the f32 reference (and the kernel's f32 matmul path) use the full
    # precision MXU path so the tight-tolerance comparison is meaningful.
    jax.config.update("jax_default_matmul_precision", "highest")

    B, T, E, H = 2, 8, 32, 4   # batch, seq, embed_dim, num_heads

    root = jax.random.PRNGKey(0)
    kq, kk, kv, kp, kb1, kb2 = jax.random.split(root, 6)
    query = jax.random.normal(kq, (B, T, E), jnp.float32)
    key = jax.random.normal(kk, (B, T, E), jnp.float32)
    value = jax.random.normal(kv, (B, T, E), jnp.float32)
    params = init_params(kp, E)
    # The module inits biases to 0; use small non-zero biases to also exercise
    # the bias path of the kernel.
    params["in_proj_bias"] = 0.1 * jax.random.normal(kb1, (3 * E,), jnp.float32)
    params["out_proj_bias"] = 0.1 * jax.random.normal(kb2, (E,), jnp.float32)

    ref_out, ref_w = reference_mha(query, key, value, params, H)

    # 1) f32 compute path: tight parity with the PyTorch math (exact softmax
    #    normalization, f32 matmul accumulation).
    out32, w32 = multihead_attention_pallas(query, key, value, params, H,
                                            compute_dtype=jnp.float32)
    jax.block_until_ready((out32, w32))
    assert jnp.allclose(out32, ref_out, atol=2e-3, rtol=2e-3)
    assert jnp.allclose(w32, ref_w, atol=2e-3, rtol=2e-3)

    # 2) Default bf16-MXU path: tolerance relaxed for bf16 operand rounding
    #    (structural/semantic errors would be O(1), far above this).
    out16, w16 = multihead_attention_pallas(query, key, value, params, H)
    jax.block_until_ready((out16, w16))
    assert jnp.allclose(out16, ref_out, atol=8e-2, rtol=8e-2)
    assert jnp.allclose(w16, ref_w, atol=8e-2, rtol=8e-2)

    # 3) need_weights=False fast path (drops the O(B*T*S) HBM write).
    out_nw, w_nw = multihead_attention_pallas(query, key, value, params, H,
                                              compute_dtype=jnp.float32,
                                              need_weights=False)
    jax.block_until_ready(out_nw)
    assert w_nw is None
    assert jnp.allclose(out_nw, ref_out, atol=2e-3, rtol=2e-3)

    # 4) Tiling paths: block_b > 1 (flattened-M reshape) and block_t < T.
    B2, T2, E2, H2 = 4, 64, 64, 4
    k1, k2, k3, k4 = jax.random.split(jax.random.PRNGKey(1), 4)
    q2 = jax.random.normal(k1, (B2, T2, E2), jnp.float32)
    kk2 = jax.random.normal(k2, (B2, T2, E2), jnp.float32)
    vv2 = jax.random.normal(k3, (B2, T2, E2), jnp.float32)
    p2 = init_params(k4, E2)
    ref_out2, ref_w2 = reference_mha(q2, kk2, vv2, p2, H2)
    out2, w2 = multihead_attention_pallas(q2, kk2, vv2, p2, H2,
                                          compute_dtype=jnp.float32,
                                          block_t=32, block_b=2)
    jax.block_until_ready((out2, w2))
    assert jnp.allclose(out2, ref_out2, atol=2e-3, rtol=2e-3)
    assert jnp.allclose(w2, ref_w2, atol=2e-3, rtol=2e-3)

    print("KERNEL_OK")
</pallas_src>

<mosaic_0001>
module attributes {stable_mosaic.version = 11 : i64} {
  func.func @_mha_kernel(%arg0: i32, %arg1: i32, %arg2: memref<1x8x32xf32, #tpu.memory_space<vmem>>, %arg3: memref<1x8x32xf32, #tpu.memory_space<vmem>>, %arg4: memref<1x8x32xf32, #tpu.memory_space<vmem>>, %arg5: memref<3x32x32xf32, #tpu.memory_space<vmem>>, %arg6: memref<3x1x32xf32, #tpu.memory_space<vmem>>, %arg7: memref<32x32xf32, #tpu.memory_space<vmem>>, %arg8: memref<1x32xf32, #tpu.memory_space<vmem>>, %arg9: memref<1x8x32xf32, #tpu.memory_space<vmem>>, %arg10: memref<1x8x8xf32, #tpu.memory_space<vmem>>, %arg11: memref<1x8x32xf32, #tpu.memory_space<vmem>>) attributes {dimension_semantics = [#tpu.dimension_semantics<parallel>, #tpu.dimension_semantics<parallel>], iteration_bounds = array<i64: 2, 1>, scalar_prefetch = 0 : i64, scratch_operands = 1 : i64, tpu.core_type = #tpu.core_type<tc>, window_params = [{transform_indices = @transform_0, window_bounds = array<i64: 1, 8, 32>}, {transform_indices = @transform_1, window_bounds = array<i64: 1, 8, 32>}, {transform_indices = @transform_2, window_bounds = array<i64: 1, 8, 32>}, {pipeline_mode = #tpu.pipeline_mode<synchronous>, transform_indices = @transform_3, window_bounds = array<i64: 3, 32, 32>}, {pipeline_mode = #tpu.pipeline_mode<synchronous>, transform_indices = @transform_4, window_bounds = array<i64: 3, 1, 32>}, {pipeline_mode = #tpu.pipeline_mode<synchronous>, transform_indices = @transform_5, window_bounds = array<i64: 32, 32>}, {pipeline_mode = #tpu.pipeline_mode<synchronous>, transform_indices = @transform_6, window_bounds = array<i64: 1, 32>}, {transform_indices = @transform_7, window_bounds = array<i64: 1, 8, 32>}, {transform_indices = @transform_8, window_bounds = array<i64: 1, 8, 8>}]} {
    %c0 = arith.constant 0 : index
    %c0_0 = arith.constant 0 : index
    %c0_1 = arith.constant 0 : index
    %0 = vector.load %arg2[%c0, %c0_0, %c0_1] : memref<1x8x32xf32, #tpu.memory_space<vmem>>, vector<1x8x32xf32>
    %1 = vector.shape_cast %0 : vector<1x8x32xf32> to vector<8x32xf32>
    %c0_2 = arith.constant 0 : index
    %c0_3 = arith.constant 0 : index
    %c0_4 = arith.constant 0 : index
    %2 = vector.load %arg3[%c0_2, %c0_3, %c0_4] : memref<1x8x32xf32, #tpu.memory_space<vmem>>, vector<1x8x32xf32>
    %3 = vector.shape_cast %2 : vector<1x8x32xf32> to vector<8x32xf32>
    %c0_5 = arith.constant 0 : index
    %c0_6 = arith.constant 0 : index
    %c0_7 = arith.constant 0 : index
    %4 = vector.load %arg4[%c0_5, %c0_6, %c0_7] : memref<1x8x32xf32, #tpu.memory_space<vmem>>, vector<1x8x32xf32>
    %5 = vector.shape_cast %4 : vector<1x8x32xf32> to vector<8x32xf32>
    %c0_8 = arith.constant 0 : index
    %c0_9 = arith.constant 0 : index
    %c0_10 = arith.constant 0 : index
    %6 = vector.load %arg5[%c0_8, %c0_9, %c0_10] : memref<3x32x32xf32, #tpu.memory_space<vmem>>, vector<1x32x32xf32>
    %7 = vector.shape_cast %6 : vector<1x32x32xf32> to vector<32x32xf32>
    %cst = arith.constant dense<0.000000e+00> : vector<8x32xf32>
    %8 = tpu.matmul %1, %7, %cst {dimension_numbers = #tpu.dot_dimension_numbers<[1], [0], [0], [1], [0, 0, 1, 1], [], []>, precision = #tpu.contract_precision<fp32>} : vector<8x32xf32>, vector<32x32xf32>, vector<8x32xf32> -> vector<8x32xf32>
    %c0_11 = arith.constant 0 : index
    %c0_12 = arith.constant 0 : index
    %c0_13 = arith.constant 0 : index
    %9 = vector.load %arg6[%c0_11, %c0_12, %c0_13] : memref<3x1x32xf32, #tpu.memory_space<vmem>>, vector<1x1x32xf32>
    %10 = vector.shape_cast %9 : vector<1x1x32xf32> to vector<1x32xf32>
    %11 = vector.broadcast %10 : vector<1x32xf32> to vector<8x32xf32>
    %12 = arith.addf %8, %11 : vector<8x32xf32>
    %cst_14 = arith.constant 0.353553385 : f32
    %13 = vector.broadcast %cst_14 : f32 to vector<8x32xf32>
    %14 = arith.mulf %12, %13 : vector<8x32xf32>
    %c1 = arith.constant 1 : index
    %c0_15 = arith.constant 0 : index
    %c0_16 = arith.constant 0 : index
    %15 = vector.load %arg5[%c1, %c0_15, %c0_16] : memref<3x32x32xf32, #tpu.memory_space<vmem>>, vector<1x32x32xf32>
    %16 = vector.shape_cast %15 : vector<1x32x32xf32> to vector<32x32xf32>
    %cst_17 = arith.constant dense<0.000000e+00> : vector<8x32xf32>
    %17 = tpu.matmul %3, %16, %cst_17 {dimension_numbers = #tpu.dot_dimension_numbers<[1], [0], [0], [1], [0, 0, 1, 1], [], []>, precision = #tpu.contract_precision<fp32>} : vector<8x32xf32>, vector<32x32xf32>, vector<8x32xf32> -> vector<8x32xf32>
    %c1_18 = arith.constant 1 : index
    %c0_19 = arith.constant 0 : index
    %c0_20 = arith.constant 0 : index
    %18 = vector.load %arg6[%c1_18, %c0_19, %c0_20] : memref<3x1x32xf32, #tpu.memory_space<vmem>>, vector<1x1x32xf32>
    %19 = vector.shape_cast %18 : vector<1x1x32xf32> to vector<1x32xf32>
    %20 = vector.broadcast %19 : vector<1x32xf32> to vector<8x32xf32>
    %21 = arith.addf %17, %20 : vector<8x32xf32>
    %c2 = arith.constant 2 : index
    %c0_21 = arith.constant 0 : index
    %c0_22 = arith.constant 0 : index
    %22 = vector.load %arg5[%c2, %c0_21, %c0_22] : memref<3x32x32xf32, #tpu.memory_space<vmem>>, vector<1x32x32xf32>
    %23 = vector.shape_cast %22 : vector<1x32x32xf32> to vector<32x32xf32>
    %cst_23 = arith.constant dense<0.000000e+00> : vector<8x32xf32>
    %24 = tpu.matmul %5, %23, %cst_23 {dimension_numbers = #tpu.dot_dimension_numbers<[1], [0], [0], [1], [0, 0, 1, 1], [], []>, precision = #tpu.contract_precision<fp32>} : vector<8x32xf32>, vector<32x32xf32>, vector<8x32xf32> -> vector<8x32xf32>
    %c2_24 = arith.constant 2 : index
    %c0_25 = arith.constant 0 : index
    %c0_26 = arith.constant 0 : index
    %25 = vector.load %arg6[%c2_24, %c0_25, %c0_26] : memref<3x1x32xf32, #tpu.memory_space<vmem>>, vector<1x1x32xf32>
    %26 = vector.shape_cast %25 : vector<1x1x32xf32> to vector<1x32xf32>
    %27 = vector.broadcast %26 : vector<1x32xf32> to vector<8x32xf32>
    %28 = arith.addf %24, %27 : vector<8x32xf32>
    %29 = vector.shape_cast %14 : vector<8x32xf32> to vector<1x8x32xf32>
    %30 = vector.shape_cast %21 : vector<8x32xf32> to vector<1x8x32xf32>
    %31 = vector.shape_cast %28 : vector<8x32xf32> to vector<1x8x32xf32>
    %32 = vector.extract_strided_slice %29 {offsets = [0, 0, 0], sizes = [1, 8, 8], strides = [1, 1, 1]} : vector<1x8x32xf32> to vector<1x8x8xf32>
    %33 = vector.extract_strided_slice %30 {offsets = [0, 0, 0], sizes = [1, 8, 8], strides = [1, 1, 1]} : vector<1x8x32xf32> to vector<1x8x8xf32>
    %34 = vector.extract_strided_slice %31 {offsets = [0, 0, 0], sizes = [1, 8, 8], strides = [1, 1, 1]} : vector<1x8x32xf32> to vector<1x8x8xf32>
    "tpu.trace_start"() <{level = 10 : i32, message = "btd,bsd->bts"}> : () -> ()
    %cst_27 = arith.constant dense<0.000000e+00> : vector<1x8x8xf32>
    %35 = tpu.matmul %32, %33, %cst_27 {dimension_numbers = #tpu.dot_dimension_numbers<[2], [2], [1], [1], [0, 0, 0, 1, 1, 1], [0], [0]>, precision = #tpu.contract_precision<fp32>} : vector<1x8x8xf32>, vector<1x8x8xf32>, vector<1x8x8xf32> -> vector<1x8x8xf32>
    "tpu.trace_stop"() : () -> ()
    %cst_28 = arith.constant dense<0xFF800000> : vector<1x8xf32>
    %36 = vector.multi_reduction <maximumf>, %35, %cst_28 [2] : vector<1x8x8xf32> to vector<1x8xf32>
    %37 = vector.shape_cast %36 : vector<1x8xf32> to vector<1x8x1xf32>
    %38 = vector.broadcast %37 : vector<1x8x1xf32> to vector<1x8x8xf32>
    %39 = arith.subf %35, %38 : vector<1x8x8xf32>
    %40 = math.exp %39 : vector<1x8x8xf32>
    %cst_29 = arith.constant dense<0.000000e+00> : vector<1x8xf32>
    %41 = vector.multi_reduction <add>, %40, %cst_29 [2] : vector<1x8x8xf32> to vector<1x8xf32>
    %42 = vector.shape_cast %41 : vector<1x8xf32> to vector<1x8x1xf32>
    %cst_30 = arith.constant 1.000000e+00 : f32
    %43 = vector.broadcast %cst_30 : f32 to vector<1x8x1xf32>
    %44 = arith.divf %43, %42 : vector<1x8x1xf32>
    %45 = vector.broadcast %44 : vector<1x8x1xf32> to vector<1x8x8xf32>
    %46 = arith.mulf %40, %45 : vector<1x8x8xf32>
    %cst_31 = arith.constant 2.500000e-01 : f32
    %47 = vector.broadcast %cst_31 : f32 to vector<1x8x8xf32>
    %48 = arith.mulf %46, %47 : vector<1x8x8xf32>
    %c0_32 = arith.constant 0 : index
    %c0_33 = arith.constant 0 : index
    %c0_34 = arith.constant 0 : index
    %49 = vector.load %arg10[%c0_32, %c0_33, %c0_34] : memref<1x8x8xf32, #tpu.memory_space<vmem>>, vector<1x8x8xf32>
    tpu.vector_store %arg10[%c0_32, %c0_33, %c0_34], %48 {strides = array<i32>} : memref<1x8x8xf32, #tpu.memory_space<vmem>>, vector<1x8x8xf32>,
    "tpu.trace_start"() <{level = 10 : i32, message = "bts,bsd->btd"}> : () -> ()
    %cst_35 = arith.constant dense<0.000000e+00> : vector<1x8x8xf32>
    %50 = tpu.matmul %46, %34, %cst_35 {dimension_numbers = #tpu.dot_dimension_numbers<[2], [1], [1], [2], [0, 0, 0, 1, 1, 2], [0], [0]>, precision = #tpu.contract_precision<fp32>} : vector<1x8x8xf32>, vector<1x8x8xf32>, vector<1x8x8xf32> -> vector<1x8x8xf32>
    "tpu.trace_stop"() : () -> ()
    %c0_36 = arith.constant 0 : index
    %c0_37 = arith.constant 0 : index
    %c0_38 = arith.constant 0 : index
    %51 = vector.load %arg11[%c0_36, %c0_37, %c0_38] : memref<1x8x32xf32, #tpu.memory_space<vmem>>, vector<1x8x8xf32>
    tpu.vector_store %arg11[%c0_36, %c0_37, %c0_38], %50 {strides = array<i32>} : memref<1x8x32xf32, #tpu.memory_space<vmem>>, vector<1x8x8xf32>,
    %52 = vector.extract_strided_slice %29 {offsets = [0, 0, 8], sizes = [1, 8, 8], strides = [1, 1, 1]} : vector<1x8x32xf32> to vector<1x8x8xf32>
    %53 = vector.extract_strided_slice %30 {offsets = [0, 0, 8], sizes = [1, 8, 8], strides = [1, 1, 1]} : vector<1x8x32xf32> to vector<1x8x8xf32>
    %54 = vector.extract_strided_slice %31 {offsets = [0, 0, 8], sizes = [1, 8, 8], strides = [1, 1, 1]} : vector<1x8x32xf32> to vector<1x8x8xf32>
    "tpu.trace_start"() <{level = 10 : i32, message = "btd,bsd->bts"}> : () -> ()
    %cst_39 = arith.constant dense<0.000000e+00> : vector<1x8x8xf32>
    %55 = tpu.matmul %52, %53, %cst_39 {dimension_numbers = #tpu.dot_dimension_numbers<[2], [2], [1], [1], [0, 0, 0, 1, 1, 1], [0], [0]>, precision = #tpu.contract_precision<fp32>} : vector<1x8x8xf32>, vector<1x8x8xf32>, vector<1x8x8xf32> -> vector<1x8x8xf32>
    "tpu.trace_stop"() : () -> ()
    %cst_40 = arith.constant dense<0xFF800000> : vector<1x8xf32>
    %56 = vector.multi_reduction <maximumf>, %55, %cst_40 [2] : vector<1x8x8xf32> to vector<1x8xf32>
    %57 = vector.shape_cast %56 : vector<1x8xf32> to vector<1x8x1xf32>
    %58 = vector.broadcast %57 : vector<1x8x1xf32> to vector<1x8x8xf32>
    %59 = arith.subf %55, %58 : vector<1x8x8xf32>
    %60 = math.exp %59 : vector<1x8x8xf32>
    %cst_41 = arith.constant dense<0.000000e+00> : vector<1x8xf32>
    %61 = vector.multi_reduction <add>, %60, %cst_41 [2] : vector<1x8x8xf32> to vector<1x8xf32>
    %62 = vector.shape_cast %61 : vector<1x8xf32> to vector<1x8x1xf32>
    %cst_42 = arith.constant 1.000000e+00 : f32
    %63 = vector.broadcast %cst_42 : f32 to vector<1x8x1xf32>
    %64 = arith.divf %63, %62 : vector<1x8x1xf32>
    %65 = vector.broadcast %64 : vector<1x8x1xf32> to vector<1x8x8xf32>
    %66 = arith.mulf %60, %65 : vector<1x8x8xf32>
    %c0_43 = arith.constant 0 : index
    %c0_44 = arith.constant 0 : index
    %c0_45 = arith.constant 0 : index
    %67 = vector.load %arg10[%c0_43, %c0_44, %c0_45] : memref<1x8x8xf32, #tpu.memory_space<vmem>>, vector<1x8x8xf32>
    %cst_46 = arith.constant 2.500000e-01 : f32
    %68 = vector.broadcast %cst_46 : f32 to vector<1x8x8xf32>
    %69 = arith.mulf %66, %68 : vector<1x8x8xf32>
    %70 = arith.addf %67, %69 : vector<1x8x8xf32>
    %c0_47 = arith.constant 0 : index
    %c0_48 = arith.constant 0 : index
    %c0_49 = arith.constant 0 : index
    %71 = vector.load %arg10[%c0_47, %c0_48, %c0_49] : memref<1x8x8xf32, #tpu.memory_space<vmem>>, vector<1x8x8xf32>
    tpu.vector_store %arg10[%c0_47, %c0_48, %c0_49], %70 {strides = array<i32>} : memref<1x8x8xf32, #tpu.memory_space<vmem>>, vector<1x8x8xf32>,
    "tpu.trace_start"() <{level = 10 : i32, message = "bts,bsd->btd"}> : () -> ()
    %cst_50 = arith.constant dense<0.000000e+00> : vector<1x8x8xf32>
    %72 = tpu.matmul %66, %54, %cst_50 {dimension_numbers = #tpu.dot_dimension_numbers<[2], [1], [1], [2], [0, 0, 0, 1, 1, 2], [0], [0]>, precision = #tpu.contract_precision<fp32>} : vector<1x8x8xf32>, vector<1x8x8xf32>, vector<1x8x8xf32> -> vector<1x8x8xf32>
    "tpu.trace_stop"() : () -> ()
    %c0_51 = arith.constant 0 : index
    %c0_52 = arith.constant 0 : index
    %c8 = arith.constant 8 : index
    %73 = vector.load %arg11[%c0_51, %c0_52, %c8] : memref<1x8x32xf32, #tpu.memory_space<vmem>>, vector<1x8x8xf32>
    tpu.vector_store %arg11[%c0_51, %c0_52, %c8], %72 {strides = array<i32>} : memref<1x8x32xf32, #tpu.memory_space<vmem>>, vector<1x8x8xf32>,
    %74 = vector.extract_strided_slice %29 {offsets = [0, 0, 16], sizes = [1, 8, 8], strides = [1, 1, 1]} : vector<1x8x32xf32> to vector<1x8x8xf32>
    %75 = vector.extract_strided_slice %30 {offsets = [0, 0, 16], sizes = [1, 8, 8], strides = [1, 1, 1]} : vector<1x8x32xf32> to vector<1x8x8xf32>
    %76 = vector.extract_strided_slice %31 {offsets = [0, 0, 16], sizes = [1, 8, 8], strides = [1, 1, 1]} : vector<1x8x32xf32> to vector<1x8x8xf32>
    "tpu.trace_start"() <{level = 10 : i32, message = "btd,bsd->bts"}> : () -> ()
    %cst_53 = arith.constant dense<0.000000e+00> : vector<1x8x8xf32>
    %77 = tpu.matmul %74, %75, %cst_53 {dimension_numbers = #tpu.dot_dimension_numbers<[2], [2], [1], [1], [0, 0, 0, 1, 1, 1], [0], [0]>, precision = #tpu.contract_precision<fp32>} : vector<1x8x8xf32>, vector<1x8x8xf32>, vector<1x8x8xf32> -> vector<1x8x8xf32>
    "tpu.trace_stop"() : () -> ()
    %cst_54 = arith.constant dense<0xFF800000> : vector<1x8xf32>
    %78 = vector.multi_reduction <maximumf>, %77, %cst_54 [2] : vector<1x8x8xf32> to vector<1x8xf32>
    %79 = vector.shape_cast %78 : vector<1x8xf32> to vector<1x8x1xf32>
    %80 = vector.broadcast %79 : vector<1x8x1xf32> to vector<1x8x8xf32>
    %81 = arith.subf %77, %80 : vector<1x8x8xf32>
    %82 = math.exp %81 : vector<1x8x8xf32>
    %cst_55 = arith.constant dense<0.000000e+00> : vector<1x8xf32>
    %83 = vector.multi_reduction <add>, %82, %cst_55 [2] : vector<1x8x8xf32> to vector<1x8xf32>
    %84 = vector.shape_cast %83 : vector<1x8xf32> to vector<1x8x1xf32>
    %cst_56 = arith.constant 1.000000e+00 : f32
    %85 = vector.broadcast %cst_56 : f32 to vector<1x8x1xf32>
    %86 = arith.divf %85, %84 : vector<1x8x1xf32>
    %87 = vector.broadcast %86 : vector<1x8x1xf32> to vector<1x8x8xf32>
    %88 = arith.mulf %82, %87 : vector<1x8x8xf32>
    %c0_57 = arith.constant 0 : index
    %c0_58 = arith.constant 0 : index
    %c0_59 = arith.constant 0 : index
    %89 = vector.load %arg10[%c0_57, %c0_58, %c0_59] : memref<1x8x8xf32, #tpu.memory_space<vmem>>, vector<1x8x8xf32>
    %cst_60 = arith.constant 2.500000e-01 : f32
    %90 = vector.broadcast %cst_60 : f32 to vector<1x8x8xf32>
    %91 = arith.mulf %88, %90 : vector<1x8x8xf32>
    %92 = arith.addf %89, %91 : vector<1x8x8xf32>
    %c0_61 = arith.constant 0 : index
    %c0_62 = arith.constant 0 : index
    %c0_63 = arith.constant 0 : index
    %93 = vector.load %arg10[%c0_61, %c0_62, %c0_63] : memref<1x8x8xf32, #tpu.memory_space<vmem>>, vector<1x8x8xf32>
    tpu.vector_store %arg10[%c0_61, %c0_62, %c0_63], %92 {strides = array<i32>} : memref<1x8x8xf32, #tpu.memory_space<vmem>>, vector<1x8x8xf32>,
    "tpu.trace_start"() <{level = 10 : i32, message = "bts,bsd->btd"}> : () -> ()
    %cst_64 = arith.constant dense<0.000000e+00> : vector<1x8x8xf32>
    %94 = tpu.matmul %88, %76, %cst_64 {dimension_numbers = #tpu.dot_dimension_numbers<[2], [1], [1], [2], [0, 0, 0, 1, 1, 2], [0], [0]>, precision = #tpu.contract_precision<fp32>} : vector<1x8x8xf32>, vector<1x8x8xf32>, vector<1x8x8xf32> -> vector<1x8x8xf32>
    "tpu.trace_stop"() : () -> ()
    %c0_65 = arith.constant 0 : index
    %c0_66 = arith.constant 0 : index
    %c16 = arith.constant 16 : index
    %95 = vector.load %arg11[%c0_65, %c0_66, %c16] : memref<1x8x32xf32, #tpu.memory_space<vmem>>, vector<1x8x8xf32>
    tpu.vector_store %arg11[%c0_65, %c0_66, %c16], %94 {strides = array<i32>} : memref<1x8x32xf32, #tpu.memory_space<vmem>>, vector<1x8x8xf32>,
    %96 = vector.extract_strided_slice %29 {offsets = [0, 0, 24], sizes = [1, 8, 8], strides = [1, 1, 1]} : vector<1x8x32xf32> to vector<1x8x8xf32>
    %97 = vector.extract_strided_slice %30 {offsets = [0, 0, 24], sizes = [1, 8, 8], strides = [1, 1, 1]} : vector<1x8x32xf32> to vector<1x8x8xf32>
    %98 = vector.extract_strided_slice %31 {offsets = [0, 0, 24], sizes = [1, 8, 8], strides = [1, 1, 1]} : vector<1x8x32xf32> to vector<1x8x8xf32>
    "tpu.trace_start"() <{level = 10 : i32, message = "btd,bsd->bts"}> : () -> ()
    %cst_67 = arith.constant dense<0.000000e+00> : vector<1x8x8xf32>
    %99 = tpu.matmul %96, %97, %cst_67 {dimension_numbers = #tpu.dot_dimension_numbers<[2], [2], [1], [1], [0, 0, 0, 1, 1, 1], [0], [0]>, precision = #tpu.contract_precision<fp32>} : vector<1x8x8xf32>, vector<1x8x8xf32>, vector<1x8x8xf32> -> vector<1x8x8xf32>
    "tpu.trace_stop"() : () -> ()
    %cst_68 = arith.constant dense<0xFF800000> : vector<1x8xf32>
    %100 = vector.multi_reduction <maximumf>, %99, %cst_68 [2] : vector<1x8x8xf32> to vector<1x8xf32>
    %101 = vector.shape_cast %100 : vector<1x8xf32> to vector<1x8x1xf32>
    %102 = vector.broadcast %101 : vector<1x8x1xf32> to vector<1x8x8xf32>
    %103 = arith.subf %99, %102 : vector<1x8x8xf32>
    %104 = math.exp %103 : vector<1x8x8xf32>
    %cst_69 = arith.constant dense<0.000000e+00> : vector<1x8xf32>
    %105 = vector.multi_reduction <add>, %104, %cst_69 [2] : vector<1x8x8xf32> to vector<1x8xf32>
    %106 = vector.shape_cast %105 : vector<1x8xf32> to vector<1x8x1xf32>
    %cst_70 = arith.constant 1.000000e+00 : f32
    %107 = vector.broadcast %cst_70 : f32 to vector<1x8x1xf32>
    %108 = arith.divf %107, %106 : vector<1x8x1xf32>
    %109 = vector.broadcast %108 : vector<1x8x1xf32> to vector<1x8x8xf32>
    %110 = arith.mulf %104, %109 : vector<1x8x8xf32>
    %c0_71 = arith.constant 0 : index
    %c0_72 = arith.constant 0 : index
    %c0_73 = arith.constant 0 : index
    %111 = vector.load %arg10[%c0_71, %c0_72, %c0_73] : memref<1x8x8xf32, #tpu.memory_space<vmem>>, vector<1x8x8xf32>
    %cst_74 = arith.constant 2.500000e-01 : f32
    %112 = vector.broadcast %cst_74 : f32 to vector<1x8x8xf32>
    %113 = arith.mulf %110, %112 : vector<1x8x8xf32>
    %114 = arith.addf %111, %113 : vector<1x8x8xf32>
    %c0_75 = arith.constant 0 : index
    %c0_76 = arith.constant 0 : index
    %c0_77 = arith.constant 0 : index
    %115 = vector.load %arg10[%c0_75, %c0_76, %c0_77] : memref<1x8x8xf32, #tpu.memory_space<vmem>>, vector<1x8x8xf32>
    tpu.vector_store %arg10[%c0_75, %c0_76, %c0_77], %114 {strides = array<i32>} : memref<1x8x8xf32, #tpu.memory_space<vmem>>, vector<1x8x8xf32>,
    "tpu.trace_start"() <{level = 10 : i32, message = "bts,bsd->btd"}> : () -> ()
    %cst_78 = arith.constant dense<0.000000e+00> : vector<1x8x8xf32>
    %116 = tpu.matmul %110, %98, %cst_78 {dimension_numbers = #tpu.dot_dimension_numbers<[2], [1], [1], [2], [0, 0, 0, 1, 1, 2], [0], [0]>, precision = #tpu.contract_precision<fp32>} : vector<1x8x8xf32>, vector<1x8x8xf32>, vector<1x8x8xf32> -> vector<1x8x8xf32>
    "tpu.trace_stop"() : () -> ()
    %c0_79 = arith.constant 0 : index
    %c0_80 = arith.constant 0 : index
    %c24 = arith.constant 24 : index
    %117 = vector.load %arg11[%c0_79, %c0_80, %c24] : memref<1x8x32xf32, #tpu.memory_space<vmem>>, vector<1x8x8xf32>
    tpu.vector_store %arg11[%c0_79, %c0_80, %c24], %116 {strides = array<i32>} : memref<1x8x32xf32, #tpu.memory_space<vmem>>, vector<1x8x8xf32>,
    %c0_81 = arith.constant 0 : index
    %c0_82 = arith.constant 0 : index
    %c0_83 = arith.constant 0 : index
    %118 = vector.load %arg11[%c0_81, %c0_82, %c0_83] : memref<1x8x32xf32, #tpu.memory_space<vmem>>, vector<1x8x32xf32>
    %119 = vector.shape_cast %118 : vector<1x8x32xf32> to vector<8x32xf32>
    %c0_84 = arith.constant 0 : index
    %c0_85 = arith.constant 0 : index
    %120 = vector.load %arg7[%c0_84, %c0_85] : memref<32x32xf32, #tpu.memory_space<vmem>>, vector<32x32xf32>
    %cst_86 = arith.constant dense<0.000000e+00> : vector<8x32xf32>
    %121 = tpu.matmul %119, %120, %cst_86 {dimension_numbers = #tpu.dot_dimension_numbers<[1], [0], [0], [1], [0, 0, 1, 1], [], []>, precision = #tpu.contract_precision<fp32>} : vector<8x32xf32>, vector<32x32xf32>, vector<8x32xf32> -> vector<8x32xf32>
    %c0_87 = arith.constant 0 : index
    %c0_88 = arith.constant 0 : index
    %122 = vector.load %arg8[%c0_87, %c0_88] : memref<1x32xf32, #tpu.memory_space<vmem>>, vector<1x32xf32>
    %123 = vector.broadcast %122 : vector<1x32xf32> to vector<8x32xf32>
    %124 = arith.addf %121, %123 : vector<8x32xf32>
    %125 = vector.shape_cast %124 : vector<8x32xf32> to vector<1x8x32xf32>
    %c0_89 = arith.constant 0 : index
    %c0_90 = arith.constant 0 : index
    %c0_91 = arith.constant 0 : index
    %126 = vector.load %arg9[%c0_89, %c0_90, %c0_91] : memref<1x8x32xf32, #tpu.memory_space<vmem>>, vector<1x8x32xf32>
    tpu.vector_store %arg9[%c0_89, %c0_90, %c0_91], %125 {strides = array<i32>} : memref<1x8x32xf32, #tpu.memory_space<vmem>>, vector<1x8x32xf32>,
    return
  }
  func.func @transform_0(%arg0: i32, %arg1: i32) -> (i32, i32, i32) {
    %c0_i32 = arith.constant 0 : i32
    %c0_i32_0 = arith.constant 0 : i32
    return %arg0, %arg1, %c0_i32 : i32, i32, i32
  }
  func.func @transform_1(%arg0: i32, %arg1: i32) -> (i32, i32, i32) {
    %c0_i32 = arith.constant 0 : i32
    %c0_i32_0 = arith.constant 0 : i32
    %c0_i32_1 = arith.constant 0 : i32
    return %arg0, %c0_i32, %c0_i32_0 : i32, i32, i32
  }
  func.func @transform_2(%arg0: i32, %arg1: i32) -> (i32, i32, i32) {
    %c0_i32 = arith.constant 0 : i32
    %c0_i32_0 = arith.constant 0 : i32
    %c0_i32_1 = arith.constant 0 : i32
    return %arg0, %c0_i32, %c0_i32_0 : i32, i32, i32
  }
  func.func @transform_3(%arg0: i32, %arg1: i32) -> (i32, i32, i32) {
    %c0_i32 = arith.constant 0 : i32
    %c0_i32_0 = arith.constant 0 : i32
    %c0_i32_1 = arith.constant 0 : i32
    %c0_i32_2 = arith.constant 0 : i32
    return %c0_i32, %c0_i32_0, %c0_i32_1 : i32, i32, i32
  }
  func.func @transform_4(%arg0: i32, %arg1: i32) -> (i32, i32, i32) {
    %c0_i32 = arith.constant 0 : i32
    %c0_i32_0 = arith.constant 0 : i32
    %c0_i32_1 = arith.constant 0 : i32
    %c0_i32_2 = arith.constant 0 : i32
    return %c0_i32, %c0_i32_0, %c0_i32_1 : i32, i32, i32
  }
  func.func @transform_5(%arg0: i32, %arg1: i32) -> (i32, i32) {
    %c0_i32 = arith.constant 0 : i32
    %c0_i32_0 = arith.constant 0 : i32
    %c0_i32_1 = arith.constant 0 : i32
    return %c0_i32, %c0_i32_0 : i32, i32
  }
  func.func @transform_6(%arg0: i32, %arg1: i32) -> (i32, i32) {
    %c0_i32 = arith.constant 0 : i32
    %c0_i32_0 = arith.constant 0 : i32
    %c0_i32_1 = arith.constant 0 : i32
    return %c0_i32, %c0_i32_0 : i32, i32
  }
  func.func @transform_7(%arg0: i32, %arg1: i32) -> (i32, i32, i32) {
    %c0_i32 = arith.constant 0 : i32
    %c0_i32_0 = arith.constant 0 : i32
    return %arg0, %arg1, %c0_i32 : i32, i32, i32
  }
  func.func @transform_8(%arg0: i32, %arg1: i32) -> (i32, i32, i32) {
    %c0_i32 = arith.constant 0 : i32
    %c0_i32_0 = arith.constant 0 : i32
    return %arg0, %arg1, %c0_i32 : i32, i32, i32
  }
}

</mosaic_0001>

<bundles_post_ra>
// kernel: tpu_custom_call.1
= control target key start
LH: loop header
LB: loop body
LE: loop exit
PB: predicated region body
PF: predicated region fallthrough
CT: control target
= control target key end

     0   :  { %s8593_s0 = inlined_call_operand.hbm [shape: f32[2,8,32], index: 0, kind: input, shape index: {}]   ;;  %s8594_s1 = inlined_call_operand.hbm [shape: f32[2,8,32], index: 1, kind: input, shape index: {}]   ;;  %s8595_s2 = inlined_call_operand.hbm [shape: f32[2,8,32], index: 2, kind: input, shape index: {}]   ;;  %s8596_s3 = inlined_call_operand.hbm [shape: f32[3,32,32], index: 3, kind: input, shape index: {}]   ;;  %s8597_s4 = inlined_call_operand.vmem [shape: f32[3,1,32], index: 4, kind: input, shape index: {}]   ;;  %s8598_s5 = inlined_call_operand.hbm [shape: f32[32,32], index: 5, kind: input, shape index: {}]   ;;  %s8599_s6 = inlined_call_operand.vmem [shape: f32[1,32], index: 6, kind: input, shape index: {}]   ;;  %s8600_s7 = inlined_call_operand.hbm [shape: f32[2,8,32], index: 7, kind: output, shape index: {0}]   ;;  %s8601_s8 = inlined_call_operand.hbm [shape: f32[2,8,8], index: 8, kind: output, shape index: {1}]  }
   0x1   :  { %8622 = sst [smem:[#allocation26_spill]] %s8594_s1 }
   0x2   :  { %8623 = sst [smem:[#allocation27_spill]] %s8596_s3 }
   0x3   :  { %8624 = sst [smem:[#allocation28_spill]] %s8598_s5 }
   0x4   :  { %14 = vsyncpa [#allocation4], 0 }
   0x5   :  { %16 = vsyncpa [#allocation4 + $0x1], 0 }
   0x6   :  { %17 = vsyncpa [#allocation7], 0 }
   0x7   :  { %19 = vsyncpa [#allocation7 + $0x1], 0 }
   0x8   :  { %20 = vsyncpa [#allocation10], 0 }
   0x9   :  { %21 = vsyncpa [#allocation5], 0 }
   0xa   :  { %23 = vsyncpa [#allocation5 + $0x1], 0 }
   0xb   :  { %24 = vsyncpa [#allocation14], 0 }
   0xc   :  { %26 = vsyncpa [#allocation14 + $0x1], 0  ;;  %s7846_s27 = smov 0   ;;  %s7848_s28 = smov 0  }
   0xd   :  { %s7850_s29 = smov 0   ;;  %s7852_s30 = smov 0  }
   0xe   :  { %s7854_s9 = smov 0   ;;  %s7856_s10 = smov 0  }
   0xf LB: > { %8625 = sst [smem:[#allocation20_spill]] %s7761_s27  ;;  %s7877_s11 = sadd.s32 4294967295, %s7781_s10   ;;  %s7781_s10 = sphi %s7856_s10, %s32_s10   ;;  %s7777_s9 = sphi %s7854_s9, %s8663_s9   ;;  %s7773_s30 = sphi %s7852_s30, %s8662_s30   ;;  %s7769_s29 = sphi %s7850_s29, %s8666_s29   ;;  %s7765_s28 = sphi %s7848_s28, %s8665_s28   ;;  %s7761_s27 = sphi %s7846_s27, %s8664_s27  }
  0x10   : > { %8626 = sst [smem:[#allocation21_spill]] %s7777_s9  ;;  %s6370_s12 = sadd.s32 4294967294, %s7781_s10  }
  0x11   : > { %8627 = sst [smem:[#allocation22_spill]] %s7781_s10  ;;  %p66_p0 = scmp.ne.s32.totalorder %s7765_s28, %s7761_s27 }
  0x12   : > { %p8602_p1 = scmp.eq.s32.totalorder %s7877_s11, 0  ;;  %p234_p3 = scmp.eq.s32.totalorder %s6370_s12, 1 }
  0x13   : > { %p6371_p5 = scmp.ge.s32.totalorder %s7781_s10, 1  ;;  %p269_p7 = scmp.lt.s32.totalorder %s7781_s10, 3 }
  0x14   : > { %p7886_p4 = por %p8602_p1, %p66_p0  ;;  %p7891_p6 = por %p234_p3, %p66_p0 }
  0x15   : > { %p7896_p8 = pnand %p6371_p5, %p269_p7  ;;  %s7783_s16 = smov [#allocation9]  }
  0x16   : > { %s8628_s13 = scalar_select %p7886_p4, 1, 0 }
  0x17   : > { %s8629_s14 = scalar_select %p7891_p6, 1, 0 }
  0x18   : > { %s8631_s15 = scalar_select %p7896_p8, 1, 0 }
  0x19   : > { %8630 = sst [smem:[#allocation23_spill]] %s8629_s14  ;;  %s281_s17 = sshll.u32 %s7783_s16, 4  ;;  %s282_s17 = int_to_ptr.vmem [resolvable:$true] %s281_s17 }
  0x1a   : > { %p7406_p9 = pneg %p7896_p8  ;;  %s44_s19 = sadd.s32 1, %s7777_s9 }
  0x1b   : > { %s8633_s3 = sld [smem:[#allocation27_spill]] }
  0x1c   : > { %p7905_p11 = pnand %p7406_p9, %p8602_p1 }
  0x1e   : > { %s8632_s18 = scalar_select %p7905_p11, 1, 0 }
  0x1f   : > { %p8614_p13 = pneg %p7905_p11 }
  0x21   : > { %s7513_s22 = scalar_lea.hbm %s8633_s3, 1536 }
  0x22   : > { %p7514_p12 = scmp.ne.s32.totalorder %s8633_s3, %s7513_s22  ;;  %p7520_p5 = scmp.lt.u32.totalorder %s7513_s22, %s8633_s3 }
  0x24   : > { %p7516_p0 = pnand %p8614_p13, %p7514_p12 }
  0x26   : > { %p7517_p3 = pneg %p7516_p0 }
  0x28   : > { %p7522_p7 = pnand %p7520_p5, %p7517_p3 }
  0x2a   : > { %7525 = shalt.err (!%p7522_p7)
}
  0x2b   : > { %s7526_s12 = scalar_lea.vmem %s282_s17, 1536  ;;  %p7534_p2 = scmp.lt.s32.totalorder %s282_s17, %s282_s17 }
  0x2c   : > { %p7527_p9 = scmp.ne.s32.totalorder %s282_s17, %s7526_s12  ;;  %p7535_p6 = scmp.lt.s32.totalorder %s7526_s12, %s7526_s12 }
  0x2e   : > { %p7529_p10 = pnand %p7527_p9, %p8614_p13  ;;  %p7536_p4 = por %p7535_p6, %p7534_p2 }
  0x30   : > { %p7530_p1 = pneg %p7529_p10 }
  0x32   : > { %p7537_p8 = pnand %p7536_p4, %p7530_p1 }
  0x34   : > { %7540 = shalt.err (!%p7537_p8)
}
  0x35   : > { %s8605_s16 = smov 128   ;;  %s8606_s20 = smov 8  }
  0x36   : > { %7409 = dma.hbm_to_vmem [thread:$0]  (!%p7905_p11), %s8633_s3, 1536, %s282_s17, [#allocation10], %s8605_s16, %s8605_s16, %s8606_s20  }
  0x37   : > { %p46_p1 = scmp.ge.s32.totalorder %s44_s19, 2  ;;  %s53_s23 = sadd.s32 1, %s7769_s29 }
  0x38   : > { %p60_p2 = scmp.ne.s32.totalorder %s7769_s29, %s7765_s28  ;;  %p61_p4 = scmp.eq.s32.totalorder %s7781_s10, 0 }
  0x39   : > { %s8668_s19 = smov (%p46_p1, %s44_s19), 0  ;;  %p8635_p8 = scmp.eq.s32.totalorder %s7877_s11, 1 }
  0x3a   : > { %8634 = sst [smem:[#allocation24_spill]] %s8668_s19  ;;  %p62_p6 = por %p61_p4, %p60_p2 }
  0x3b   : > { %p7943_p10 = por %p8635_p8, %p60_p2  ;;  %s48_s25 = ssub.s32 %s7777_s9, %s8668_s19 }
  0x3c   : > { %p7432_p12 = scmp.lt.s32.totalorder %s7781_s10, 2  ;;  %p51_p0 = scmp.eq.s32.totalorder %s48_s25, 0 }
  0x3d   : > { %s8636_s24 = scalar_select %p7943_p10, 1, 0 }
  0x3e   : > { %s8607_s26 = sand.u32 1, %s7769_s29   ;;  %s7956_s12 = sshll.u32 %s7777_s9, 7 }
  0x3f   : > { %s7953_s17 = sshll.u32 %s8607_s26, 3  ;;  %p7961_p3 = pnand %p7432_p12, %p62_p6 }
  0x40   : > { %s7959_s21 = scalar_select %p51_p0, %s7769_s29, %s53_s23  }
  0x41   : > { %s8638_s22 = scalar_select %p7961_p3, 1, 0 }
  0x42   : > { %8637 = sst [smem:[#allocation25_spill]] %s7959_s21  ;;  %s333_s16 = sand.u32 1, %s7781_s10  }
  0x43   : > { %s8639_s1 = sld [smem:[#allocation26_spill]]  ;;  %s337_s26 = scalar_lea.vmem [#allocation6], %s7953_s17 }
  0x44   : > { %s344_s19 = sshll.u32 %s337_s26, 4  ;;  %s7786_s23 = smov [#allocation11]   ;;  %s7973_s19 = int_to_ptr.vmem [resolvable:$true] %s344_s19 }
  0x45   : > { %s7975_s9 = sshll.u32 %s7786_s23, 4  ;;  %s7977_s21 = scalar_lea.sflag [#allocation7], %s333_s16  ;;  %s298_s9 = int_to_ptr.vmem [resolvable:$true] %s7975_s9 }
  0x46   : > { %p7983_p7 = pneg %p7961_p3 }
  0x48   : > { %s8640_s3 = scalar_select %p7983_p7, 1, 0 }
  0x49   : > { %s7970_s25 = scalar_lea.hbm %s8639_s1, %s7956_s12  ;;  %s7546_s10 = scalar_lea.hbm %s8639_s1, 256 }
  0x4a   : > { %s7541_s14 = scalar_lea.hbm %s7970_s25, 128  ;;  %p7547_p2 = scmp.lt.u32.totalorder %s7970_s25, %s8639_s1 }
  0x4b   : > { %p7542_p5 = scmp.ne.s32.totalorder %s7970_s25, %s7541_s14  ;;  %p7548_p4 = scmp.lt.u32.totalorder %s7546_s10, %s7541_s14 }
  0x4c   : > { %p7550_p8 = scmp.lt.u32.totalorder %s7541_s14, %s7970_s25 }
  0x4d   : > { %p7544_p9 = pnand %p7983_p7, %p7542_p5  ;;  %p7549_p6 = por %p7548_p4, %p7547_p2 }
  0x4f   : > { %p7545_p1 = pneg %p7544_p9  ;;  %p7551_p12 = por %p7550_p8, %p7549_p6 }
  0x51   : > { %p7552_p0 = pnand %p7551_p12, %p7545_p1 }
  0x53   : > { %7555 = shalt.err (!%p7552_p0)
}
  0x54   : > { %s7556_s16 = scalar_lea.vmem %s7973_s19, 128  ;;  %s7787_s20 = smov [#allocation6]  }
  0x55   : > { %p7557_p5 = scmp.ne.s32.totalorder %s7973_s19, %s7556_s16  ;;  %s7561_s26 = sshll.u32 %s7787_s20, 4  ;;  %s7562_s26 = int_to_ptr.vmem [resolvable:$false] %s7561_s26 }
  0x56   : > { %s7563_s27 = scalar_lea.vmem %s7562_s26, 256  ;;  %p7564_p10 = scmp.lt.s32.totalorder %s7973_s19, %s7562_s26 }
  0x57   : > { %p7559_p9 = pnand %p7557_p5, %p7983_p7  ;;  %p7565_p11 = scmp.lt.s32.totalorder %s7563_s27, %s7556_s16 }
  0x59   : > { %p7560_p13 = pneg %p7559_p9  ;;  %p7566_p2 = por %p7565_p11, %p7564_p10 }
  0x5b   : > { %p7567_p4 = pnand %p7566_p2, %p7560_p13 }
  0x5d   : > { %7570 = shalt.err (!%p7567_p4)
}
  0x5e   : > { %7419 = dma.hbm_to_vmem [thread:$0]  (!%p7961_p3), %s7970_s25, 128, %s7973_s19, %s7977_s21  }
  0x5f   : > { %s8641_s5 = sld [smem:[#allocation28_spill]]  ;;  %p8642_p11 = scmp.ne.s32.totalorder %s8632_s18, 0 }
  0x61   : > { %p8643_p13 = pneg %p8642_p11 }
  0x65   : > { %s7571_s23 = scalar_lea.hbm %s8641_s5, 512 }
  0x66   : > { %p7572_p1 = scmp.ne.s32.totalorder %s8641_s5, %s7571_s23  ;;  %p7578_p8 = scmp.lt.u32.totalorder %s7571_s23, %s8641_s5 }
  0x68   : > { %p7574_p10 = pnand %p7572_p1, %p8643_p13 }
  0x6a   : > { %p7575_p6 = pneg %p7574_p10 }
  0x6c   : > { %p7580_p12 = pnand %p7578_p8, %p7575_p6 }
  0x6e   : > { %7583 = shalt.err (!%p7580_p12)
}
  0x6f   : > { %s7584_s19 = scalar_lea.vmem %s298_s9, 512  ;;  %p8644_p5 = pmov %p8643_p13 }
  0x70   : > { %p7585_p0 = scmp.ne.s32.totalorder %s298_s9, %s7584_s19  ;;  %p7592_p4 = scmp.lt.s32.totalorder %s298_s9, %s298_s9 }
  0x71   : > { %p7593_p3 = scmp.lt.s32.totalorder %s7584_s19, %s7584_s19 }
  0x72   : > { %p7587_p9 = pnand %p7585_p0, %p8644_p5 }
  0x73   : > { %p7594_p7 = por %p7593_p3, %p7592_p4 }
  0x74   : > { %p7588_p2 = pneg %p7587_p9 }
  0x76   : > { %p7595_p1 = pnand %p7594_p7, %p7588_p2 }
  0x78   : > { %7598 = shalt.err (!%p7595_p1)
}
  0x79   : > { %s8645_s1 = smov 8   ;;  %s8646_s25 = smov 128  }
  0x7a   : > { %7412 = dma.hbm_to_vmem [thread:$0]  (!%p8642_p11), %s8641_s5, 512, %s298_s9, [#allocation10], %s8646_s25, %s8646_s25, %s8645_s1  }
  0x7b   : > { %s8035_s20 = scalar_lea.hbm %s8593_s0, %s7956_s12  ;;  %s318_s18 = scalar_lea.vmem [#allocation3], %s7953_s17 }
  0x7c   : > { %s326_s16 = sshll.u32 %s318_s18, 4  ;;  %s8044_s27 = scalar_lea.hbm %s8595_s2, %s7956_s12  ;;  %s8038_s16 = int_to_ptr.vmem [resolvable:$true] %s326_s16 }
  0x7d   : > { %s8647_s10 = sand.u32 1, %s7769_s29   ;;  %s7599_s1 = scalar_lea.hbm %s8035_s20, 128 }
  0x7e   : > { %s315_s9 = scalar_lea.sflag [#allocation4], %s8647_s10  ;;  %p7600_p3 = scmp.ne.s32.totalorder %s8035_s20, %s7599_s1 }
  0x7f   : > { %p8648_p7 = scmp.ne.s32.totalorder %s8640_s3, 0  ;;  %s7604_s23 = scalar_lea.hbm %s8593_s0, 256 }
  0x80   : > { %p7605_p10 = scmp.lt.u32.totalorder %s8035_s20, %s8593_s0  ;;  %p7606_p6 = scmp.lt.u32.totalorder %s7604_s23, %s7599_s1 }
  0x81   : > { %p7602_p11 = pnand %p7600_p3, %p8648_p7  ;;  %p7608_p12 = scmp.lt.u32.totalorder %s7599_s1, %s8035_s20 }
  0x82   : > { %p7607_p8 = por %p7606_p6, %p7605_p10 }
  0x83   : > { %p7603_p13 = pneg %p7602_p11 }
  0x84   : > { %p7609_p0 = por %p7608_p12, %p7607_p8 }
  0x86   : > { %p7610_p5 = pnand %p7609_p0, %p7603_p13 }
  0x88   : > { %7613 = shalt.err (!%p7610_p5)
}
  0x89   : > { %s7614_s12 = scalar_lea.vmem %s8038_s16, 128  ;;  %s7788_s26 = smov [#allocation3]  }
  0x8a   : > { %p7615_p9 = scmp.ne.s32.totalorder %s8038_s16, %s7614_s12  ;;  %s7619_s19 = sshll.u32 %s7788_s26, 4  ;;  %s7620_s19 = int_to_ptr.vmem [resolvable:$false] %s7619_s19 }
  0x8b   : > { %s7621_s5 = scalar_lea.vmem %s7620_s19, 256  ;;  %p7622_p1 = scmp.lt.s32.totalorder %s8038_s16, %s7620_s19 }
  0x8c   : > { %p7617_p2 = pnand %p7615_p9, %p8648_p7  ;;  %p7623_p3 = scmp.lt.s32.totalorder %s7621_s5, %s7614_s12 }
  0x8e   : > { %p7618_p4 = pneg %p7617_p2  ;;  %p7624_p11 = por %p7623_p3, %p7622_p1 }
  0x90   : > { %p7625_p10 = pnand %p7624_p11, %p7618_p4 }
  0x92   : > { %7628 = shalt.err (!%p7625_p10)
}
  0x93   : > { %p8649_p13 = scmp.ne.s32.totalorder %s8638_s22, 0  ;;  %s355_s10 = scalar_lea.vmem [#allocation8], %s7953_s17 }
  0x94   : > { %s362_s1 = sshll.u32 %s355_s10, 4  ;;  %s7629_s25 = scalar_lea.hbm %s8044_s27, 128  ;;  %s363_s1 = int_to_ptr.vmem [resolvable:$true] %s362_s1 }
  0x95   : > { %7416 = dma.hbm_to_vmem [thread:$0]  (!%p8649_p13), %s8035_s20, 128, %s8038_s16, %s315_s9  }
  0x96   : > { %p7630_p6 = scmp.ne.s32.totalorder %s8044_s27, %s7629_s25  ;;  %s7634_s18 = scalar_lea.hbm %s8595_s2, 256 }
  0x97   : > { %p7635_p0 = scmp.lt.u32.totalorder %s8044_s27, %s8595_s2  ;;  %p7636_p5 = scmp.lt.u32.totalorder %s7634_s18, %s7629_s25 }
  0x98   : > { %p7632_p8 = pnand %p7630_p6, %p8648_p7  ;;  %p7638_p2 = scmp.lt.u32.totalorder %s7629_s25, %s8044_s27 }
  0x99   : > { %p7637_p9 = por %p7636_p5, %p7635_p0 }
  0x9a   : > { %p7633_p12 = pneg %p7632_p8 }
  0x9b   : > { %p7639_p4 = por %p7638_p2, %p7637_p9 }
  0x9d   : > { %p7640_p1 = pnand %p7639_p4, %p7633_p12 }
  0x9f   : > { %7643 = shalt.err (!%p7640_p1)
}
  0xa0   : > { %s7644_s17 = scalar_lea.vmem %s363_s1, 128  ;;  %s7789_s20 = smov [#allocation8]  }
  0xa1   : > { %p7645_p3 = scmp.ne.s32.totalorder %s363_s1, %s7644_s17  ;;  %s7649_s16 = sshll.u32 %s7789_s20, 4  ;;  %s7650_s16 = int_to_ptr.vmem [resolvable:$false] %s7649_s16 }
  0xa2   : > { %s7651_s9 = scalar_lea.vmem %s7650_s16, 256  ;;  %p7652_p6 = scmp.lt.s32.totalorder %s363_s1, %s7650_s16 }
  0xa3   : > { %p7647_p11 = pnand %p7645_p3, %p8648_p7  ;;  %p7653_p8 = scmp.lt.s32.totalorder %s7651_s9, %s7644_s17 }
  0xa5   : > { %p7648_p10 = pneg %p7647_p11  ;;  %p7654_p13 = por %p7653_p8, %p7652_p6 }
  0xa7   : > { %p7655_p0 = pnand %p7654_p13, %p7648_p10 }
  0xa9   : > { %7658 = shalt.err (!%p7655_p0)
}
  0xaa   : > { %p8650_p5 = scmp.ne.s32.totalorder %s8638_s22, 0  ;;  %p8651_p12 = scmp.ne.s32.totalorder %s8631_s15, 0 }
  0xab   : > { %s8091_s3 = sand.u32 (!%p8651_p12), 1, %s7765_s28   ;;  %p8652_p7 = scmp.ne.s32.totalorder (!%p8651_p12), %s8628_s13, 0 }
  0xac   : > { %7422 = dma.hbm_to_vmem [thread:$0]  (!%p8650_p5), %s8044_s27, 128, %s363_s1, %s7977_s21  }
  0xad   : > { %371 = sbr.rel (%p8651_p12) target bundleno = 1922 (0x782), region = 48  ;;  %s8094_s19 = sshll.u32 (!%p8651_p12), %s8091_s3, 3 }
  0xae   : > { %s374_s5 = scalar_lea.sflag (!%p8651_p12), [#allocation4], %s8091_s3  ;;  %s377_s10 = scalar_lea.vmem (!%p8651_p12), [#allocation3], %s8094_s19 }
  0xb4   : > { %7740 = dma.done.wait (%p8652_p7), %s374_s5, 128  }
  0xb5   : > { %7742 = vsyncadd (%p8652_p7), %s374_s5, 4294967168  ;;  %s382_s15 = sand.u32 1, %s7877_s11   ;;  %s386_s22 = scalar_lea.vmem [#allocation6], %s8094_s19 }
  0xb6   : > { %s383_s21 = scalar_lea.sflag [#allocation7], %s382_s15 }
  0xb7   : > { %7744 = dma.done.wait (%p8652_p7), %s383_s21, 256  }
  0xb8   : > { %7746 = vsyncadd (%p8652_p7), %s383_s21, 4294967040  ;;  %s395_s27 = scalar_lea.vmem [#allocation8], %s8094_s19  ;;  %p8653_p13 = scmp.eq.s32.totalorder %s7877_s11, 0 }
  0xba   : > { %7748 = dma.done.wait (%p8653_p13), [#allocation10], 2048   ;;  %p8654_p9 = pmov %p8653_p13 }
  0xbb   : > { %v7790_v0 = vmov 0.0|0.0   ;;  %vm7791_vm0 = vmmov 0   ;;  %v7792_v1 = vmov 0.0   ;;  %vm465_vm1 = vcmask 261120   ;;  %v454_v2 = vld [vmem:[#allocation9] sm:$0xff]  ;;  %v455_v3 = vld [vmem:[#allocation9 + $0x8] sm:$0xff] }
  0xbc   : > { %7750 = vsyncadd (%p8654_p9), [#allocation10], 4294965248  ;;  %7121 = vmatprep.subr.bf16.mxu1 %v7790_v0  ;;  %7139 = vmatprep.subr.bf16.mxu0 %v7790_v0  ;;  %v456_v4 = vld [vmem:[#allocation9 + $0x10] sm:$0xff]  ;;  %v470_v5 = vand.u32 4294901760, %v454_v2  ;;  %v473_v6 = vand.u32 4294901760, %v455_v3  ;;  %v457_v7 = vld [vmem:[#allocation9 + $0x18] sm:$0xff] }
  0xbd   : > { %6625 = vmatprep.mubr.msk.f32.mxu1 %vm7791_vm0, %v7792_v1  ;;  %6658 = vmatprep.mubr.msk.f32.mxu0 %vm7791_vm0, %v7792_v1  ;;  %v476_v8 = vand.u32 4294901760, %v456_v4  ;;  %v451_v9 = vld [vmem:[%s377_s10] sm:$0xff]  ;;  %v479_v10 = vand.u32 4294901760, %v457_v7  ;;  %v956_v37 = vld [vmem:[#allocation9 + $0x20] sm:$0xff]  ;;  %v957_v38 = vld [vmem:[#allocation9 + $0x28] sm:$0xff]  ;;  %s7793_s1 = smov 112  }
  0xbe   : > { %v467_v11 = vsel %vm465_vm1, %v451_v9, 0  ;;  %v7122_v12 = vpack.c.bf16 %v473_v6, %v470_v5  ;;  %v8120_v13 = vsub.f32 %v454_v2, %v470_v5  ;;  %v8122_v14 = vsub.f32 %v455_v3, %v473_v6  ;;  %v452_v39 = vld [vmem:[%s386_s22] sm:$0xff]  ;;  %v958_v45 = vld [vmem:[#allocation9 + $0x30] sm:$0xff]  ;;  %v959_v46 = vld [vmem:[#allocation9 + $0x38] sm:$0xff]  ;;  %s7794_s25 = smov 120   ;;  %s7795_s18 = smov 104  }
  0xbf   : > { %v8124_v15 = vsub.f32 %v456_v4, %v476_v8  ;;  %v8126_v16 = vsub.f32 %v457_v7, %v479_v10  ;;  %v8128_v17 = vand.u32 4294901760, %v467_v11  ;;  %v8130_v18 = vpack.c.bf16 %v479_v10, %v476_v8  ;;  %s8373_s17 = scalar_lea.vmem [#allocation13], %s8094_s19  ;;  %s7796_s20 = smov 8  }
  0xc0   : > { %7123 = vmatpush3.bf16.msra.mxu1 %v7122_v12  ;;  %7141 = vmatpush3.bf16.msra.mxu0 %v7122_v12  ;;  %v551_v19 = vand.u32 4294901760, %v8120_v13  ;;  %v558_v20 = vand.u32 4294901760, %v8122_v14  ;;  %v972_v42 = vand.u32 4294901760, %v956_v37  ;;  %v975_v43 = vand.u32 4294901760, %v957_v38  ;;  %s7797_s16 = smov 16   ;;  %s7798_s9 = smov 24  }
  0xc1   : > { %v565_v21 = vand.u32 4294901760, %v8124_v15  ;;  %7124 = vmatprep.subr.bf16.mxu1 %v7790_v0  ;;  %7142 = vmatprep.subr.bf16.mxu0 %v7790_v0  ;;  %v8138_v22 = vsub.f32 %v467_v11, %v8128_v17  ;;  %v572_v23 = vand.u32 4294901760, %v8126_v16  ;;  %v969_v44 = vsel %vm465_vm1, %v452_v39, 0  ;;  %s6397_s5 = sshll.u32 %s7773_s30, 7  ;;  %s6194_s22 = sshll.u32 %s8373_s17, 4  ;;  %s6195_s22 = int_to_ptr.vmem [resolvable:$true] %s6194_s22 }
  0xc2   : > { %v552_v24 = vsub.f32 %v8120_v13, %v551_v19  ;;  %v559_v25 = vsub.f32 %v8122_v14, %v558_v20  ;;  %v7146_v31 = vpack.c.bf16 %v558_v20, %v551_v19  ;;  %v7134_v47 = vpack.c.bf16 %v8122_v14, %v8120_v13  ;;  %v1458_v19 = vld [vmem:[#allocation9 + $0x48] sm:$0xff]  ;;  %v453_v20 = vld [vmem:[%s395_s27] sm:$0xff]  ;;  %s8513_s21 = scalar_lea.hbm %s8601_s8, %s6397_s5  ;;  %s6166_s27 = scalar_lea.sflag [#allocation14], %s8091_s3 }
  0xc3   : > { %v566_v26 = vsub.f32 %v8124_v15, %v565_v21  ;;  %v540_v27 = vand.u32 4294901760, %v8138_v22  ;;  %v573_v28 = vsub.f32 %v8126_v16, %v572_v23  ;;  %v7149_v40 = vpack.c.bf16 %v572_v23, %v565_v21  ;;  %s7659_s11 = scalar_lea.vmem %s6195_s22, 128  ;;  %p8655_p4 = scmp.ne.s32.totalorder %s8636_s24, 0 }
  0xc4   : > { %7126 = vmatpush3.bf16.msra.mxu1 %v8130_v18  ;;  %7144 = vmatpush3.bf16.msra.mxu0 %v8130_v18  ;;  %v553_v29 = vand.u32 4294901760, %v552_v24  ;;  %v560_v30 = vand.u32 4294901760, %v559_v25  ;;  %v8163_v48 = vand.u32 4294901760, %v969_v44  ;;  %v8165_v49 = vsub.f32 %v956_v37, %v972_v42  ;;  %p7660_p2 = scmp.ne.s32.totalorder %s6195_s22, %s7659_s11  ;;  %s7799_s13 = smov [#allocation13]  }
  0xc5   : > { %v541_v32 = vsub.f32 %v8138_v22, %v540_v27  ;;  %7127 = vmatprep.subr.bf16.mxu1 %v7790_v0  ;;  %7145 = vmatprep.subr.bf16.mxu0 %v7790_v0  ;;  %v567_v34 = vand.u32 4294901760, %v566_v26  ;;  %v574_v35 = vand.u32 4294901760, %v573_v28  ;;  %v8167_v50 = vsub.f32 %v957_v38, %v975_v43  ;;  %v1459_v28 = vld [vmem:[#allocation9 + $0x50] sm:$0xff] }
  0xc6   : > { %v7128_v33 = vpack.c.bf16 %v560_v30, %v553_v29  ;;  %v978_v51 = vand.u32 4294901760, %v958_v45  ;;  %v981_v52 = vand.u32 4294901760, %v959_v46  ;;  %v7137_v53 = vpack.c.bf16 %v8126_v16, %v8124_v15  ;;  %v1460_v29 = vld [vmem:[#allocation9 + $0x58] sm:$0xff]  ;;  %p7661_p1 = pnand %p7660_p2, %p8655_p4 }
  0xc7   : > { %v542_v36 = vand.u32 4294901760, %v541_v32  ;;  %6659 = vmatmul.mubr.f32.vlgmr.msra.gmra.mrb[0].mxu0 %v540_v27  ;;  %v7131_v41 = vpack.c.bf16 %v574_v35, %v567_v34  ;;  %v1041_v54 = vsub.f32 %v969_v44, %v8163_v48  ;;  %v1053_v57 = vand.u32 4294901760, %v8165_v49 }
  0xc8   : > { %7147 = vmatpush3.bf16.msra.mxu0 %v7146_v31  ;;  %6669 = vmatprep.mubr.msk.f32.mxu0 %vm7791_vm0, %v7792_v1  ;;  %v1066_v55 = vsub.f32 %v958_v45, %v978_v51  ;;  %v1073_v56 = vsub.f32 %v959_v46, %v981_v52  ;;  %v1060_v58 = vand.u32 4294901760, %v8167_v50  ;;  %v7158_v59 = vpack.c.bf16 %v975_v43, %v972_v42  ;;  %p7662_p3 = pneg %p7661_p1 }
  0xc9   : > { %6626 = vmatmul.mubr.f32.vlgmr.msra.gmra.mrb[0].mxu1 %v542_v36  ;;  %7148 = vmatprep.subr.bf16.mxu0 %v7790_v0  ;;  %v1042_v60 = vand.u32 4294901760, %v1041_v54  ;;  %v1054_v61 = vsub.f32 %v8165_v49, %v1053_v57  ;;  %v7161_v3 = vpack.c.bf16 %v981_v52, %v978_v51  ;;  %v7170_v14 = vpack.c.bf16 %v8167_v50, %v8165_v49 }
  0xca   : > { %7129 = vmatpush3.bf16.msra.mxu1 %v7128_v33  ;;  %6636 = vmatprep.mubr.msk.f32.mxu1 %vm7791_vm0, %v7792_v1  ;;  %v1061_v62 = vsub.f32 %v8167_v50, %v1060_v58  ;;  %v1067_v63 = vand.u32 4294901760, %v1066_v55  ;;  %v1074_v2 = vand.u32 4294901760, %v1073_v56  ;;  %v7173_v15 = vpack.c.bf16 %v1073_v56, %v1066_v55 }
  0xcb   : > { %7130 = vmatprep.subr.bf16.mxu1 %v7790_v0  ;;  %v1043_v4 = vsub.f32 %v1041_v54, %v1042_v60  ;;  %v1055_v5 = vand.u32 4294901760, %v1054_v61  ;;  %v7182_v16 = vpack.c.bf16 %v1060_v58, %v1053_v57  ;;  %v1470_v23 = vsel %vm465_vm1, %v453_v20, 0  ;;  %v6389_v57 = vld [vmem:[%s8597_s4] ss:$0 sm:$0xff] }
  0xcc   : > { %7150 = vmatpush3.bf16.msra.mxu0 %v7149_v40  ;;  %v1062_v6 = vand.u32 4294901760, %v1061_v62  ;;  %v1068_v7 = vsub.f32 %v1066_v55, %v1067_v63  ;;  %v1075_v8 = vsub.f32 %v1073_v56, %v1074_v2  ;;  %v8226_v24 = vand.u32 4294901760, %v1470_v23 }
  0xcd   : > { %7151 = vmatprep.subr.bf16.mxu0 %v7790_v0  ;;  %v1044_v9 = vand.u32 4294901760, %v1043_v4  ;;  %v1479_v31 = vand.u32 4294901760, %v1459_v28  ;;  %v1482_v32 = vand.u32 4294901760, %v1460_v29  ;;  %vm1957_vm2 = vcmask 64512  }
  0xce   : > { %7132 = vmatpush3.bf16.msra.mxu1 %v7131_v41  ;;  %v7164_v10 = vpack.c.bf16 %v1062_v6, %v1055_v5  ;;  %v1069_v11 = vand.u32 4294901760, %v1068_v7  ;;  %v1542_v30 = vsub.f32 %v1470_v23, %v8226_v24  ;;  %v6391_v6 = vld [vmem:[%s8597_s4 + $0x1] ss:$0 sm:$0xff]  ;;  %vm3801_vm3 = vcmask 130112  }
  0xcf   : > { %7133 = vmatprep.subr.bf16.mxu1 %v7790_v0  ;;  %6670 = vmatmul.mubr.f32.vlgmr.msra.gmra.mrb[0].mxu0 %v8128_v17  ;;  %v7197_v36 = vpack.c.bf16 %v1482_v32, %v1479_v31  ;;  %v1567_v37 = vsub.f32 %v1459_v28, %v1479_v31  ;;  %v1574_v38 = vsub.f32 %v1460_v29, %v1482_v32  ;;  %vm4729_vm4 = vcmask 195712  }
  0xd0   : > { %7153 = vmatpush3.bf16.msra.mxu0 %v7122_v12  ;;  %6680 = vmatprep.mubr.msk.f32.mxu0 %vm7791_vm0, %v7792_v1  ;;  %v1076_v12 = vand.u32 4294901760, %v1075_v8  ;;  %v1543_v35 = vand.u32 4294901760, %v1542_v30  ;;  %vm5657_vm5 = vcmask 261312  }
  0xd1   : > { %6637 = vmatmul.mubr.f32.vlgmr.msra.gmra.mrb[0].mxu1 %v8128_v17  ;;  %7154 = vmatprep.subr.bf16.mxu0 %v7790_v0  ;;  %v1568_v43 = vand.u32 4294901760, %v1567_v37  ;;  %v1575_v44 = vand.u32 4294901760, %v1574_v38 }
  0xd2   : > { %7135 = vmatpush3.bf16.msra.mxu1 %v7134_v47  ;;  %6647 = vmatprep.mubr.msk.f32.mxu1 %vm7791_vm0, %v7792_v1  ;;  %v7167_v13 = vpack.c.bf16 %v1076_v12, %v1069_v11  ;;  %v1544_v40 = vsub.f32 %v1542_v30, %v1543_v35 }
  0xd3   : > { %7136 = vmatprep.subr.bf16.mxu1 %v7790_v0  ;;  %v1569_v47 = vsub.f32 %v1567_v37, %v1568_v43  ;;  %v7221_v56 = vpack.c.bf16 %v1575_v44, %v1568_v43 }
  0xd4   : > { %7156 = vmatpush3.bf16.msra.mxu0 %v8130_v18  ;;  %v1457_v18 = vld [vmem:[#allocation9 + $0x40] sm:$0xff]  ;;  %v1545_v45 = vand.u32 4294901760, %v1544_v40 }
  0xd5   : > { %7193 = vmatprep.subr.bf16.mxu0 %v7790_v0  ;;  %v1473_v21 = vand.u32 4294901760, %v1457_v18  ;;  %v1570_v50 = vand.u32 4294901760, %v1569_v47 }
  0xd6   : > { %7138 = vmatpush3.bf16.msra.mxu1 %v7137_v53 }
  0xd7   : > { %7157 = vmatprep.subr.bf16.mxu1 %v7790_v0  ;;  %6681 = vmatmul.mubr.f32.vlgmr.msra.gmra.mrb[0].mxu0 %v8128_v17  ;;  %v7185_v17 = vpack.c.bf16 %v1074_v2, %v1067_v63  ;;  %v1553_v26 = vsub.f32 %v1457_v18, %v1473_v21 }
  0xd8   : > { %6757 = vmatprep.mubr.msk.f32.mxu0 %vm7791_vm0, %v7792_v1 }
  0xd9   : > { %6648 = vmatmul.mubr.f32.vlgmr.msra.gmra.mrb[0].mxu1 %v8138_v22  ;;  %v1476_v22 = vand.u32 4294901760, %v1458_v19  ;;  %v1554_v33 = vand.u32 4294901760, %v1553_v26 }
  0xda   : > { %7159 = vmatpush3.bf16.msra.mxu1 %v7158_v59  ;;  %6691 = vmatprep.mubr.msk.f32.mxu1 %vm7791_vm0, %v7792_v1 }
  0xdb   : > { %7160 = vmatprep.subr.bf16.mxu1 %v7790_v0  ;;  %v7194_v25 = vpack.c.bf16 %v1476_v22, %v1473_v21  ;;  %v1560_v27 = vsub.f32 %v1458_v19, %v1476_v22  ;;  %v1555_v39 = vsub.f32 %v1553_v26, %v1554_v33 }
  0xdd   : > { %7195 = vmatpush3.bf16.msra.mxu0 %v7194_v25  ;;  %v1561_v34 = vand.u32 4294901760, %v1560_v27  ;;  %v1556_v42 = vand.u32 4294901760, %v1555_v39  ;;  %v7206_v53 = vpack.c.bf16 %v1560_v27, %v1553_v26 }
  0xde   : > { %7162 = vmatpush3.bf16.msra.mxu1 %v7161_v3  ;;  %7196 = vmatprep.subr.bf16.mxu0 %v7790_v0 }
  0xdf   : > { %7163 = vmatprep.subr.bf16.mxu1 %v7790_v0  ;;  %v1562_v41 = vsub.f32 %v1560_v27, %v1561_v34  ;;  %v7218_v55 = vpack.c.bf16 %v1561_v34, %v1554_v33 }
  0xe1   : > { %6692 = vmatmul.mubr.f32.vlgmr.msra.gmra.mrb[2].mxu1 %v1044_v9  ;;  %7198 = vmatpush3.bf16.msra.mxu0 %v7197_v36  ;;  %v1563_v46 = vand.u32 4294901760, %v1562_v41 }
  0xe2   : > { %7165 = vmatpush3.bf16.msra.mxu1 %v7164_v10  ;;  %6702 = vmatprep.mubr.msk.f32.mxu1 %vm7791_vm0, %v7792_v1 }
  0xe3   : > { %7166 = vmatprep.subr.bf16.mxu1 %v7790_v0  ;;  %7199 = vmatprep.subr.bf16.mxu0 %v7790_v0  ;;  %v7200_v49 = vpack.c.bf16 %v1563_v46, %v1556_v42  ;;  %v6393_v42 = vld [vmem:[%s8597_s4 + $0x2] ss:$0 sm:$0xff] }
  0xe4   : > { %6758 = vmatmul.mubr.f32.vlgmr.msra.gmra.mrb[2].mxu0 %v1545_v45 }
  0xe5   : > { %6768 = vmatprep.mubr.msk.f32.mxu0 %vm7791_vm0, %v7792_v1  ;;  %7201 = vmatpush3.bf16.msra.mxu0 %v7200_v49 }
  0xe6   : > { %7168 = vmatpush3.bf16.msra.mxu1 %v7167_v13  ;;  %7202 = vmatprep.subr.bf16.mxu0 %v7790_v0 }
  0xe7   : > { %7169 = vmatprep.subr.bf16.mxu1 %v7790_v0 }
  0xe9   : > { %6703 = vmatmul.mubr.f32.vlgmr.msra.gmra.mrb[2].mxu1 %v8163_v48 }
  0xea   : > { %7171 = vmatpush3.bf16.msra.mxu1 %v7170_v14  ;;  %6713 = vmatprep.mubr.msk.f32.mxu1 %vm7791_vm0, %v7792_v1 }
  0xeb   : > { %7172 = vmatprep.subr.bf16.mxu1 %v7790_v0 }
  0xee   : > { %7174 = vmatpush3.bf16.msra.mxu1 %v7173_v15 }
  0xef   : > { %7175 = vmatprep.subr.bf16.mxu1 %v7790_v0 }
  0xf1   : > { %6714 = vmatmul.mubr.f32.vlgmr.msra.gmra.mrb[2].mxu1 %v1041_v54  ;;  %v7209_v54 = vpack.c.bf16 %v1574_v38, %v1567_v37 }
  0xf2   : > { %7177 = vmatpush3.bf16.msra.mxu1 %v7158_v59  ;;  %6724 = vmatprep.mubr.msk.f32.mxu1 %vm7791_vm0, %v7792_v1 }
  0xf3   : > { %7178 = vmatprep.subr.bf16.mxu1 %v7790_v0 }
  0xf6   : > { %7180 = vmatpush3.bf16.msra.mxu1 %v7161_v3 }
  0xf7   : > { %7181 = vmatprep.subr.bf16.mxu1 %v7790_v0 }
  0xf9   : > { %6725 = vmatmul.mubr.f32.vlgmr.msra.gmra.mrb[2].mxu1 %v1042_v60 }
  0xfa   : > { %7183 = vmatpush3.bf16.msra.mxu1 %v7182_v16  ;;  %6735 = vmatprep.mubr.msk.f32.mxu1 %vm7791_vm0, %v7792_v1 }
  0xfb   : > { %7184 = vmatprep.subr.bf16.mxu1 %v7790_v0 }
  0xfe   : > { %7186 = vmatpush3.bf16.msra.mxu1 %v7185_v17 }
  0xff   : > { %7187 = vmatprep.subr.bf16.mxu1 %v7790_v0 }
 0x101   : > { %6736 = vmatmul.mubr.f32.vlgmr.msra.gmra.mrb[2].mxu1 %v8163_v48 }
 0x102   : > { %7189 = vmatpush3.bf16.msra.mxu1 %v7158_v59  ;;  %6746 = vmatprep.mubr.msk.f32.mxu1 %vm7791_vm0, %v7792_v1 }
 0x103   : > { %7190 = vmatprep.subr.bf16.mxu1 %v7790_v0 }
 0x106   : > { %7192 = vmatpush3.bf16.msra.mxu1 %v7161_v3 }
 0x107   : > { %6815 = vmatprep.subr.mxu1 %v7792_v1 }
 0x109   : > { %6747 = vmatmul.mubr.f32.vlgmr.msra.gmra.mrb[2].mxu1 %v8163_v48  ;;  %v1576_v48 = vsub.f32 %v1574_v38, %v1575_v44 }
 0x10a   : > { %6817 = vmatprep.mubr.msk.f32.mxu1 %vm7791_vm0, %v7792_v1 }
 0x10b   : > { %v1577_v51 = vand.u32 4294901760, %v1576_v48 }
 0x10d   : > { %v7203_v52 = vpack.c.bf16 %v1577_v51, %v1570_v50 }
 0x10f   : > { %7204 = vmatpush3.bf16.msra.mxu0 %v7203_v52 }
 0x110   : > { %7205 = vmatprep.subr.bf16.mxu0 %v7790_v0 }
 0x112   : > { %6769 = vmatmul.mubr.f32.vlgmr.msra.gmra.mrb[2].mxu0 %v8226_v24 }
 0x113   : > { %7207 = vmatpush3.bf16.msra.mxu0 %v7206_v53  ;;  %6779 = vmatprep.mubr.msk.f32.mxu0 %vm7791_vm0, %v7792_v1 }
 0x114   : > { %7208 = vmatprep.subr.bf16.mxu0 %v7790_v0 }
 0x117   : > { %7210 = vmatpush3.bf16.msra.mxu0 %v7209_v54 }
 0x118   : > { %7211 = vmatprep.subr.bf16.mxu0 %v7790_v0 }
 0x11a   : > { %6780 = vmatmul.mubr.f32.vlgmr.msra.gmra.mrb[2].mxu0 %v1542_v30 }
 0x11b   : > { %7213 = vmatpush3.bf16.msra.mxu0 %v7194_v25  ;;  %6790 = vmatprep.mubr.msk.f32.mxu0 %vm7791_vm0, %v7792_v1 }
 0x11c   : > { %7214 = vmatprep.subr.bf16.mxu0 %v7790_v0 }
 0x11f   : > { %7216 = vmatpush3.bf16.msra.mxu0 %v7197_v36 }
 0x120   : > { %7217 = vmatprep.subr.bf16.mxu0 %v7790_v0 }
 0x122   : > { %6791 = vmatmul.mubr.f32.vlgmr.msra.gmra.mrb[2].mxu0 %v1543_v35 }
 0x123   : > { %7219 = vmatpush3.bf16.msra.mxu0 %v7218_v55  ;;  %6801 = vmatprep.mubr.msk.f32.mxu0 %vm7791_vm0, %v7792_v1 }
 0x124   : > { %7220 = vmatprep.subr.bf16.mxu0 %v7790_v0 }
 0x127   : > { %7222 = vmatpush3.bf16.msra.mxu0 %v7221_v56 }
 0x128   : > { %7223 = vmatprep.subr.bf16.mxu0 %v7790_v0 }
 0x12a   : > { %6802 = vmatmul.mubr.f32.vlgmr.msra.gmra.mrb[2].mxu0 %v8226_v24 }
 0x12b   : > { %7225 = vmatpush3.bf16.msra.mxu0 %v7194_v25  ;;  %6812 = vmatprep.mubr.msk.f32.mxu0 %vm7791_vm0, %v7792_v1 }
 0x12c   : > { %7226 = vmatprep.subr.bf16.mxu0 %v7790_v0 }
 0x12f   : > { %7228 = vmatpush3.bf16.msra.mxu0 %v7197_v36 }
 0x130   : > { %6875 = vmatprep.subr.mxu0 %v7792_v1 }
 0x132   : > { %6813 = vmatmul.mubr.f32.vlgmr.msra.gmra.mrb[2].mxu0 %v8226_v24 }
 0x133   : > { %6877 = vmatprep.mubr.msk.f32.mxu0 %vm7791_vm0, %v7792_v1 }
 0x1aa   : > { %v950_v58 = vpop.f32.mrb[0].mxu0 }
 0x1ab   : > { %v6682_v59 = vpop.f32.mrb[1].mxu0 }
 0x1ac   : > { %v715_v60 = vpop.f32.mrb[0].mxu1 }
 0x1ad   : > { %v7265_v61 = vadd.f32 %v6389_v57, %v715_v60  ;;  %v6649_v62 = vpop.f32.mrb[1].mxu1 }
 0x1af   : > { %v7266_v63 = vadd.f32 %v7265_v61, %v950_v58 }
 0x1b1   : > { %v954_v2 = vmul.f32 0.35355338, %v7266_v63 }
 0x1b3   : > { %3803 = vrot.lane.b32.xlu1 %v954_v2, %s7793_s1  ;;  %2874 = vrot.lane.b32.xlu0 %v954_v2, %s7794_s25  ;;  %v1959_v3 = vsel %vm1957_vm2, %v954_v2, 0 }
 0x1b4   : > { %v2030_v4 = vand.u32 4294901760, %v1959_v3 }
 0x1b6   : > { %v2031_v5 = vsub.f32 %v1959_v3, %v2030_v4 }
 0x1b8   : > { %v2032_v7 = vand.u32 4294901760, %v2031_v5 }
 0x1ba   : > { %v2033_v12 = vsub.f32 %v2031_v5, %v2032_v7 }
 0x1bc   : > { %v2034_v15 = vand.u32 4294901760, %v2033_v12 }
 0x1dc   : > { %v1452_v8 = vpop.f32.mrb[2].mxu1 }
 0x1dd   : > { %v7267_v9 = vadd.f32 %v6391_v6, %v1452_v8  ;;  %v6748_v10 = vpop.f32.mrb[3].mxu1 }
 0x1df   : > { %3805 = vrot.lane.b32.xlu1 %v7267_v9, %s7793_s1  ;;  %2876 = vrot.lane.b32.xlu0 %v7267_v9, %s7794_s25  ;;  %v1962_v11 = vsel %vm1957_vm2, %v7267_v9, 0 }
 0x1e0   : > { %v1965_v13 = vand.u32 4294901760, %v1962_v11 }
 0x1e2   : > { %6816 = vmatpush3.xpose.msra.mxu1 %v1965_v13  ;;  %v2042_v14 = vsub.f32 %v1962_v11, %v1965_v13 }
 0x1e3   : > { %4733 = vrot.lane.b32.xlu1 %v7267_v9, %s7795_s18  ;;  %4731 = vrot.lane.b32.xlu0 %v954_v2, %s7795_s18 }
 0x1e4   : > { %6820 = vmatprep.subr.mxu1 %v7792_v1  ;;  %v2043_v16 = vand.u32 4294901760, %v2042_v14 }
 0x1e5   : > { %6818 = vmatmul.mubr.f32.vlgmr.msra.gmra.mrb[4].mxu1 %v2034_v15 }
 0x1e6   : > { %v2044_v17 = vsub.f32 %v2042_v14, %v2043_v16  ;;  %6822 = vmatprep.mubr.msk.f32.mxu1 %vm7791_vm0, %v7792_v1 }
 0x1e8   : > { %v2045_v18 = vand.u32 4294901760, %v2044_v17 }
 0x1ea   : > { %6821 = vmatpush3.xpose.msra.mxu1 %v2045_v18 }
 0x1eb   : > { %6825 = vmatprep.subr.mxu1 %v7792_v1 }
 0x1ed   : > { %6823 = vmatmul.mubr.f32.vlgmr.msra.gmra.mrb[4].mxu1 %v2030_v4 }
 0x1ee   : > { %6826 = vmatpush3.xpose.msra.mxu1 %v2042_v14  ;;  %6827 = vmatprep.mubr.msk.f32.mxu1 %vm7791_vm0, %v7792_v1 }
 0x1ef   : > { %6830 = vmatprep.subr.mxu1 %v7792_v1 }
 0x1f5   : > { %6828 = vmatmul.mubr.f32.vlgmr.msra.gmra.mrb[4].mxu1 %v2031_v5 }
 0x1f6   : > { %6831 = vmatpush3.xpose.msra.mxu1 %v1965_v13  ;;  %6832 = vmatprep.mubr.msk.f32.mxu1 %vm7791_vm0, %v7792_v1 }
 0x1f7   : > { %6835 = vmatprep.subr.mxu1 %v7792_v1 }
 0x1fd   : > { %6833 = vmatmul.mubr.f32.vlgmr.msra.gmra.mrb[4].mxu1 %v2032_v7 }
 0x1fe   : > { %6836 = vmatpush3.xpose.msra.mxu1 %v2043_v16  ;;  %6837 = vmatprep.mubr.msk.f32.mxu1 %vm7791_vm0, %v7792_v1 }
 0x1ff   : > { %6840 = vmatprep.subr.mxu1 %v7792_v1 }
 0x205   : > { %6838 = vmatmul.mubr.f32.vlgmr.msra.gmra.mrb[4].mxu1 %v2030_v4  ;;  %v1953_v44 = vpop.f32.mrb[2].mxu0 }
 0x206   : > { %6841 = vmatpush3.xpose.msra.mxu1 %v1965_v13  ;;  %6842 = vmatprep.mubr.msk.f32.mxu1 %vm7791_vm0, %v7792_v1  ;;  %v8311_v45 = vadd.f32 %v6393_v42, %v1953_v44  ;;  %v6814_v46 = vpop.f32.mrb[3].mxu0 }
 0x207   : > { %6845 = vmatprep.subr.mxu1 %v7792_v1 }
 0x208   : > { %v8314_v49 = vand.u32 4294901760, %v8311_v45 }
 0x20d   : > { %6843 = vmatmul.mubr.f32.vlgmr.msra.gmra.mrb[4].mxu1 %v2030_v4 }
 0x20e   : > { %6847 = vmatprep.mubr.msk.f32.mxu1 %vm7791_vm0, %v7792_v1  ;;  %6846 = vmatpush3.msra.mxu1 %v8314_v49 }
 0x20f   : > { %6850 = vmatprep.subr.mxu1 %v7792_v1 }
 0x225   : > { %v2875_v19 = vpop.permute.xlu0 %2874  ;;  %v3804_v33 = vpop.permute.xlu1 %3803 }
 0x226   : > { %v2878_v20 = vsel %vm1957_vm2, %v2875_v19, 0  ;;  %v3807_v35 = vsel %vm1957_vm2, %v3804_v33, 0 }
 0x227   : > { %v2948_v21 = vand.u32 4294901760, %v2878_v20  ;;  %v3877_v37 = vand.u32 4294901760, %v3807_v35 }
 0x229   : > { %v2949_v22 = vsub.f32 %v2878_v20, %v2948_v21  ;;  %v3878_v39 = vsub.f32 %v3807_v35, %v3877_v37 }
 0x22b   : > { %v2950_v23 = vand.u32 4294901760, %v2949_v22  ;;  %v3879_v41 = vand.u32 4294901760, %v3878_v39 }
 0x22d   : > { %v2951_v25 = vsub.f32 %v2949_v22, %v2950_v23  ;;  %v3880_v47 = vsub.f32 %v3878_v39, %v3879_v41 }
 0x22f   : > { %v2952_v29 = vand.u32 4294901760, %v2951_v25  ;;  %v3881_v50 = vand.u32 4294901760, %v3880_v47 }
 0x251   : > { %v2877_v24 = vpop.permute.xlu0 %2876  ;;  %v3806_v34 = vpop.permute.xlu1 %3805 }
 0x252   : > { %v2880_v26 = vsel %vm1957_vm2, %v2877_v24, 0  ;;  %v3809_v36 = vsel %vm1957_vm2, %v3806_v34, 0 }
 0x253   : > { %v2883_v27 = vand.u32 4294901760, %v2880_v26  ;;  %v3812_v38 = vand.u32 4294901760, %v3809_v36 }
 0x255   : > { %v2960_v28 = vsub.f32 %v2880_v26, %v2883_v27  ;;  %6876 = vmatpush3.xpose.msra.mxu0 %v2883_v27  ;;  %v3889_v40 = vsub.f32 %v3809_v36, %v3812_v38  ;;  %v4732_v52 = vpop.permute.xlu0 %4731  ;;  %v4734_v53 = vpop.permute.xlu1 %4733 }
 0x256   : > { %6880 = vmatprep.subr.mxu0 %v7792_v1  ;;  %v4735_v54 = vsel %vm1957_vm2, %v4732_v52, 0  ;;  %v4737_v55 = vsel %vm1957_vm2, %v4734_v53, 0 }
 0x257   : > { %v2961_v30 = vand.u32 4294901760, %v2960_v28  ;;  %v3890_v43 = vand.u32 4294901760, %v3889_v40  ;;  %v4805_v56 = vand.u32 4294901760, %v4735_v54  ;;  %v4740_v57 = vand.u32 4294901760, %v4737_v55 }
 0x258   : > { %6878 = vmatmul.mubr.f32.vlgmr.msra.gmra.mrb[4].mxu0 %v2952_v29 }
 0x259   : > { %v2962_v31 = vsub.f32 %v2960_v28, %v2961_v30  ;;  %6882 = vmatprep.mubr.msk.f32.mxu0 %vm7791_vm0, %v7792_v1  ;;  %v3891_v48 = vsub.f32 %v3889_v40, %v3890_v43  ;;  %v4806_v58 = vsub.f32 %v4735_v54, %v4805_v56  ;;  %v4817_v59 = vsub.f32 %v4737_v55, %v4740_v57 }
 0x25b   : > { %v2963_v32 = vand.u32 4294901760, %v2962_v31  ;;  %v3892_v51 = vand.u32 4294901760, %v3891_v48  ;;  %v4807_v60 = vand.u32 4294901760, %v4806_v58  ;;  %v4818_v61 = vand.u32 4294901760, %v4817_v59 }
 0x25d   : > { %6881 = vmatpush3.xpose.msra.mxu0 %v2963_v32  ;;  %v4808_v62 = vsub.f32 %v4806_v58, %v4807_v60  ;;  %v4819_v63 = vsub.f32 %v4817_v59, %v4818_v61  ;;  %v2505_v32 = vsub.f32 %v8311_v45, %v8314_v49 }
 0x25e   : > { %6885 = vmatprep.subr.mxu0 %v7792_v1 }
 0x25f   : > { %v4809_v2 = vand.u32 4294901760, %v4808_v62  ;;  %v4820_v3 = vand.u32 4294901760, %v4819_v63  ;;  %v2506_v36 = vand.u32 4294901760, %v2505_v32 }
 0x260   : > { %6883 = vmatmul.mubr.f32.vlgmr.msra.gmra.mrb[4].mxu0 %v2948_v21 }
 0x261   : > { %6886 = vmatpush3.xpose.msra.mxu0 %v2960_v28  ;;  %6887 = vmatprep.mubr.msk.f32.mxu0 %vm7791_vm0, %v7792_v1 }
 0x262   : > { %6890 = vmatprep.subr.mxu0 %v7792_v1 }
 0x268   : > { %6888 = vmatmul.mubr.f32.vlgmr.msra.gmra.mrb[4].mxu0 %v2949_v22 }
 0x269   : > { %6891 = vmatpush3.xpose.msra.mxu0 %v2883_v27  ;;  %6892 = vmatprep.mubr.msk.f32.mxu0 %vm7791_vm0, %v7792_v1 }
 0x26a   : > { %6895 = vmatprep.subr.mxu0 %v7792_v1 }
 0x270   : > { %6893 = vmatmul.mubr.f32.vlgmr.msra.gmra.mrb[4].mxu0 %v2950_v23 }
 0x271   : > { %6896 = vmatpush3.xpose.msra.mxu0 %v2961_v30  ;;  %6897 = vmatprep.mubr.msk.f32.mxu0 %vm7791_vm0, %v7792_v1 }
 0x272   : > { %6900 = vmatprep.subr.mxu0 %v7792_v1 }
 0x278   : > { %6898 = vmatmul.mubr.f32.vlgmr.msra.gmra.mrb[4].mxu0 %v2948_v21 }
 0x279   : > { %6901 = vmatpush3.xpose.msra.mxu0 %v2883_v27  ;;  %6902 = vmatprep.mubr.msk.f32.mxu0 %vm7791_vm0, %v7792_v1 }
 0x27a   : > { %6935 = vmatprep.subr.mxu0 %v7792_v1 }
 0x280   : > { %6903 = vmatmul.mubr.f32.vlgmr.msra.gmra.mrb[4].mxu0 %v2948_v21 }
 0x281   : > { %6936 = vmatpush3.xpose.msra.mxu0 %v3812_v38  ;;  %6937 = vmatprep.mubr.msk.f32.mxu0 %vm7791_vm0, %v7792_v1 }
 0x282   : > { %6940 = vmatprep.subr.mxu0 %v7792_v1 }
 0x284   : > { %6938 = vmatmul.mubr.f32.vlgmr.msra.gmra.mrb[6].mxu0 %v3881_v50 }
 0x285   : > { %6941 = vmatpush3.xpose.msra.mxu0 %v3892_v51  ;;  %6942 = vmatprep.mubr.msk.f32.mxu0 %vm7791_vm0, %v7792_v1 }
 0x286   : > { %6945 = vmatprep.subr.mxu0 %v7792_v1 }
 0x28c   : > { %6943 = vmatmul.mubr.f32.vlgmr.msra.gmra.mrb[6].mxu0 %v3877_v37 }
 0x28d   : > { %6946 = vmatpush3.xpose.msra.mxu0 %v3889_v40  ;;  %6947 = vmatprep.mubr.msk.f32.mxu0 %vm7791_vm0, %v7792_v1 }
 0x28e   : > { %6950 = vmatprep.subr.mxu0 %v7792_v1 }
 0x294   : > { %6948 = vmatmul.mubr.f32.vlgmr.msra.gmra.mrb[6].mxu0 %v3878_v39 }
 0x295   : > { %6951 = vmatpush3.xpose.msra.mxu0 %v3812_v38  ;;  %6952 = vmatprep.mubr.msk.f32.mxu0 %vm7791_vm0, %v7792_v1 }
 0x296   : > { %6955 = vmatprep.subr.mxu0 %v7792_v1 }
 0x29c   : > { %6953 = vmatmul.mubr.f32.vlgmr.msra.gmra.mrb[6].mxu0 %v3879_v41  ;;  %v2507_v41 = vsub.f32 %v2505_v32, %v2506_v36 }
 0x29d   : > { %6956 = vmatpush3.xpose.msra.mxu0 %v3890_v43  ;;  %6957 = vmatprep.mubr.msk.f32.mxu0 %vm7791_vm0, %v7792_v1 }
 0x29e   : > { %6960 = vmatprep.subr.mxu0 %v7792_v1  ;;  %v2508_v44 = vand.u32 4294901760, %v2507_v41 }
 0x2a4   : > { %6958 = vmatmul.mubr.f32.vlgmr.msra.gmra.mrb[6].mxu0 %v3877_v37 }
 0x2a5   : > { %6961 = vmatpush3.xpose.msra.mxu0 %v3812_v38  ;;  %6962 = vmatprep.mubr.msk.f32.mxu0 %vm7791_vm0, %v7792_v1 }
 0x2a6   : > { %6995 = vmatprep.subr.mxu0 %v7792_v1 }
 0x2ac   : > { %6963 = vmatmul.mubr.f32.vlgmr.msra.gmra.mrb[6].mxu0 %v3877_v37 }
 0x2ad   : > { %6996 = vmatpush3.xpose.msra.mxu0 %v4740_v57  ;;  %6997 = vmatprep.mubr.msk.f32.mxu0 %vm7791_vm0, %v7792_v1 }
 0x2ae   : > { %7000 = vmatprep.subr.mxu0 %v7792_v1 }
 0x2b0   : > { %6998 = vmatmul.mubr.f32.vlgmr.msra.gmra.mrb[8].mxu0 %v4809_v2 }
 0x2b1   : > { %7001 = vmatpush3.xpose.msra.mxu0 %v4820_v3  ;;  %7002 = vmatprep.mubr.msk.f32.mxu0 %vm7791_vm0, %v7792_v1 }
 0x2b2   : > { %7005 = vmatprep.subr.mxu0 %v7792_v1 }
 0x2b8   : > { %7003 = vmatmul.mubr.f32.vlgmr.msra.gmra.mrb[8].mxu0 %v4805_v56 }
 0x2b9   : > { %7006 = vmatpush3.xpose.msra.mxu0 %v4817_v59  ;;  %7007 = vmatprep.mubr.msk.f32.mxu0 %vm7791_vm0, %v7792_v1 }
 0x2ba   : > { %7010 = vmatprep.subr.mxu0 %v7792_v1 }
 0x2c0   : > { %7008 = vmatmul.mubr.f32.vlgmr.msra.gmra.mrb[8].mxu0 %v4806_v58 }
 0x2c1   : > { %7011 = vmatpush3.xpose.msra.mxu0 %v4740_v57  ;;  %7012 = vmatprep.mubr.msk.f32.mxu0 %vm7791_vm0, %v7792_v1 }
 0x2c2   : > { %7015 = vmatprep.subr.mxu0 %v7792_v1 }
 0x2c8   : > { %7013 = vmatmul.mubr.f32.vlgmr.msra.gmra.mrb[8].mxu0 %v4807_v60 }
 0x2c9   : > { %7016 = vmatpush3.xpose.msra.mxu0 %v4818_v61  ;;  %7017 = vmatprep.mubr.msk.f32.mxu0 %vm7791_vm0, %v7792_v1 }
 0x2ca   : > { %7020 = vmatprep.subr.mxu0 %v7792_v1 }
 0x2d0   : > { %7018 = vmatmul.mubr.f32.vlgmr.msra.gmra.mrb[8].mxu0 %v4805_v56 }
 0x2d1   : > { %7021 = vmatpush3.xpose.msra.mxu0 %v4740_v57  ;;  %7022 = vmatprep.mubr.msk.f32.mxu0 %vm7791_vm0, %v7792_v1 }
 0x2d2   : > { %7229 = vmatprep.subr.bf16.mxu0 %v7790_v0 }
 0x2d8   : > { %7023 = vmatmul.mubr.f32.vlgmr.msra.gmra.mrb[8].mxu0 %v4805_v56 }
 0x2d9   : > { %7063 = vmatprep.mubr.msk.f32.mxu0 %vm7791_vm0, %v7792_v1 }
 0x2e0   : > { %v2406_v4 = vpop.f32.mrb[4].mxu1 }
 0x2e1   : > { %v6844_v5 = vpop.f32.mrb[5].mxu1  ;;  %v2410_v6 = vsel %vm1957_vm2, %v2406_v4, -inf }
 0x2e2   : > { %2411 = vmax.xlane.f32.xlu0 %v2410_v6 }
 0x353   : > { %v3324_v7 = vpop.f32.mrb[4].mxu0 }
 0x354   : > { %v6904_v8 = vpop.f32.mrb[5].mxu0  ;;  %v3328_v9 = vsel %vm1957_vm2, %v3324_v7, -inf }
 0x355   : > { %3329 = vmax.xlane.f32.xlu1 %v3328_v9 }
 0x36f   : > { %v2412_v10 = vpop.xlane.xlu0 %2411 }
 0x370   : > { %v2413_v11 = vsub.f32 %v2406_v4, %v2412_v10 }
 0x372   : > { %v2414_v12 = vmul.f32 1.442695, %v2413_v11 }
 0x374   : > { %7497 = vpow2.f32 %v2414_v12 }
 0x37e   : > { %v7498_v13 = vpop.eup %7497 }
 0x37f   : > { %v4253_v14 = vpop.f32.mrb[6].mxu0  ;;  %v2416_v15 = vsel %vm1957_vm2, %v7498_v13, 0.0 }
 0x380   : > { %v6964_v16 = vpop.f32.mrb[7].mxu0  ;;  %2417 = vadd.xlane.f32.xlu0 %v2416_v15  ;;  %v4257_v17 = vsel %vm1957_vm2, %v4253_v14, -inf }
 0x384   : > { %4258 = vmax.xlane.f32.xlu0 %v4257_v17 }
 0x3ab   : > { %v5181_v18 = vpop.f32.mrb[8].mxu0 }
 0x3ac   : > { %v7024_v19 = vpop.f32.mrb[9].mxu0  ;;  %v5185_v20 = vsel %vm1957_vm2, %v5181_v18, -inf }
 0x3ad   : > { %5186 = vmax.xlane.f32.xlu0 %v5185_v20 }
 0x3e2   : > { %v3330_v21 = vpop.xlane.xlu1 %3329 }
 0x3e3   : > { %v3331_v22 = vsub.f32 %v3324_v7, %v3330_v21 }
 0x3e5   : > { %v3332_v23 = vmul.f32 1.442695, %v3331_v22 }
 0x3e7   : > { %7499 = vpow2.f32 %v3332_v23 }
 0x3f1   : > { %v8363_v24 = vpop.eup %7499 }
 0x3f2   : > { %v3334_v25 = vsel %vm1957_vm2, %v8363_v24, 0.0 }
 0x3f3   : > { %3335 = vadd.xlane.f32.xlu1 %v3334_v25 }
 0x404   : > { %3345 = vrot.lane.b32.xlu1 %v8311_v45, %s7794_s25 }
 0x40d   : > { %v2418_v26 = vpop.xlane.xlu0 %2417 }
 0x40e   : > { %7501 = vrcp.f32 %v2418_v26 }
 0x411   : > { %v4259_v27 = vpop.xlane.xlu0 %4258 }
 0x412   : > { %v4260_v28 = vsub.f32 %v4253_v14, %v4259_v27 }
 0x414   : > { %v4261_v29 = vmul.f32 1.442695, %v4260_v28 }
 0x416   : > { %7503 = vpow2.f32 %v4261_v29 }
 0x418   : > { %v7502_v30 = vpop.eup %7501 }
 0x419   : > { %v2421_v31 = vmul.f32 %v7502_v30, %v7498_v13 }
 0x41b   : > { %v2422_v33 = vmul.f32 0.25, %v2421_v31  ;;  %v2425_v34 = vsel %vm1957_vm2, %v2421_v31, 0 }
 0x41c   : > { %v2493_v35 = vand.u32 4294901760, %v2425_v34 }
 0x41d   : > { %2423 = vst.msk [vmem:[%s8373_s17] sm:$0xff] %vm1957_vm2, %v2422_v33 }
 0x41e   : > { %v2494_v37 = vsub.f32 %v2425_v34, %v2493_v35 }
 0x420   : > { %v8377_v38 = vpop.eup %7503  ;;  %v2495_v39 = vand.u32 4294901760, %v2494_v37 }
 0x421   : > { %v4263_v40 = vsel %vm1957_vm2, %v8377_v38, 0.0 }
 0x422   : > { %4264 = vadd.xlane.f32.xlu0 %v4263_v40  ;;  %v2496_v42 = vsub.f32 %v2494_v37, %v2495_v39 }
 0x424   : > { %v2497_v43 = vand.u32 4294901760, %v2496_v42  ;;  %v3340_v58 = vld [vmem:[%s8373_s17] sm:$0xff] }
 0x426   : > { %6848 = vmatmul.mubr.f32.vlgmr.msra.gmra.mrb[6].mxu1 %v2497_v43 }
 0x427   : > { %6851 = vmatpush3.msra.mxu1 %v2508_v44  ;;  %6852 = vmatprep.mubr.msk.f32.mxu1 %vm7791_vm0, %v7792_v1 }
 0x428   : > { %6855 = vmatprep.subr.mxu1 %v7792_v1 }
 0x42e   : > { %6853 = vmatmul.mubr.f32.vlgmr.msra.gmra.mrb[6].mxu1 %v2493_v35 }
 0x42f   : > { %6856 = vmatpush3.msra.mxu1 %v2505_v32  ;;  %6857 = vmatprep.mubr.msk.f32.mxu1 %vm7791_vm0, %v7792_v1 }
 0x430   : > { %6860 = vmatprep.subr.mxu1 %v7792_v1 }
 0x436   : > { %6858 = vmatmul.mubr.f32.vlgmr.msra.gmra.mrb[6].mxu1 %v2494_v37 }
 0x437   : > { %6861 = vmatpush3.msra.mxu1 %v8314_v49  ;;  %6862 = vmatprep.mubr.msk.f32.mxu1 %vm7791_vm0, %v7792_v1 }
 0x438   : > { %4273 = vrot.lane.b32.xlu0 %v8311_v45, %s7793_s1  ;;  %6865 = vmatprep.subr.mxu1 %v7792_v1  ;;  %s7663_s1 = sshll.u32 %s7799_s13, 4  ;;  %s7664_s1 = int_to_ptr.vmem [resolvable:$false] %s7663_s1 }
 0x439   : > { %s7665_s25 = scalar_lea.vmem %s7664_s1, 256  ;;  %p7666_p11 = scmp.lt.s32.totalorder %s6195_s22, %s7664_s1 }
 0x43a   : > { %v5187_v46 = vpop.xlane.xlu0 %5186  ;;  %p7667_p10 = scmp.lt.s32.totalorder %s7665_s25, %s7659_s11 }
 0x43b   : > { %v5188_v47 = vsub.f32 %v5181_v18, %v5187_v46 }
 0x43c   : > { %5201 = vrot.lane.b32.xlu0 %v8311_v45, %s7795_s18  ;;  %p7668_p6 = por %p7667_p10, %p7666_p11 }
 0x43d   : > { %v5189_v48 = vmul.f32 1.442695, %v5188_v47 }
 0x43e   : > { %6863 = vmatmul.mubr.f32.vlgmr.msra.gmra.mrb[6].mxu1 %v2495_v39  ;;  %p7669_p8 = pnand %p7668_p6, %p7662_p3 }
 0x43f   : > { %7505 = vpow2.f32 %v5189_v48  ;;  %6866 = vmatpush3.msra.mxu1 %v2506_v36  ;;  %6867 = vmatprep.mubr.msk.f32.mxu1 %vm7791_vm0, %v7792_v1 }
 0x440   : > { %6870 = vmatprep.subr.mxu1 %v7792_v1 }
 0x446   : > { %6868 = vmatmul.mubr.f32.vlgmr.msra.gmra.mrb[6].mxu1 %v2493_v35 }
 0x447   : > { %6871 = vmatpush3.msra.mxu1 %v8314_v49  ;;  %6872 = vmatprep.mubr.msk.f32.mxu1 %vm7791_vm0, %v7792_v1 }
 0x448   : > { %6905 = vmatprep.subr.mxu1 %v7792_v1 }
 0x449   : > { %v8402_v50 = vpop.eup %7505 }
 0x44a   : > { %v5191_v45 = vsel %vm1957_vm2, %v8402_v50, 0.0 }
 0x44b   : > { %5192 = vadd.xlane.f32.xlu1 %v5191_v45  ;;  %v5661_v45 = vld [vmem:[#allocation11 + $0x8] sm:$0xff] }
 0x44e   : > { %6873 = vmatmul.mubr.f32.vlgmr.msra.gmra.mrb[6].mxu1 %v2493_v35 }
 0x44f   : > { %6907 = vmatprep.mubr.msk.f32.mxu1 %vm7791_vm0, %v7792_v1 }
 0x480   : > { %v3336_v51 = vpop.xlane.xlu1 %3335 }
 0x481   : > { %7507 = vrcp.f32 %v3336_v51  ;;  %v5662_v51 = vld [vmem:[#allocation11 + $0x10] sm:$0xff] }
 0x484   : > { %v3346_v49 = vpop.permute.xlu1 %3345 }
 0x485   : > { %v3352_v52 = vand.u32 4294901760, %v3346_v49 }
 0x487   : > { %6906 = vmatpush3.msra.mxu1 %v3352_v52  ;;  %v3429_v55 = vsub.f32 %v3346_v49, %v3352_v52 }
 0x488   : > { %6910 = vmatprep.subr.mxu1 %v7792_v1 }
 0x489   : > { %v3430_v61 = vand.u32 4294901760, %v3429_v55 }
 0x48b   : > { %v7508_v53 = vpop.eup %7507  ;;  %v3431_v2 = vsub.f32 %v3429_v55, %v3430_v61 }
 0x48c   : > { %v3339_v54 = vmul.f32 %v7508_v53, %v8363_v24  ;;  %v5663_v53 = vld [vmem:[#allocation11 + $0x18] sm:$0xff] }
 0x48d   : > { %v3432_v5 = vand.u32 4294901760, %v3431_v2 }
 0x48e   : > { %v3341_v56 = vmul.f32 0.25, %v3339_v54  ;;  %v3349_v57 = vsel %vm1957_vm2, %v3339_v54, 0  ;;  %v5681_v54 = vand.u32 4294901760, %v5662_v51 }
 0x48f   : > { %v3417_v59 = vand.u32 4294901760, %v3349_v57 }
 0x490   : > { %v3342_v60 = vadd.f32 %v3341_v56, %v3340_v58 }
 0x491   : > { %v3418_v62 = vsub.f32 %v3349_v57, %v3417_v59 }
 0x492   : > { %3343 = vst.msk [vmem:[%s8373_s17] sm:$0xff] %vm1957_vm2, %v3342_v60 }
 0x493   : > { %v3419_v63 = vand.u32 4294901760, %v3418_v62 }
 0x495   : > { %v3420_v3 = vsub.f32 %v3418_v62, %v3419_v63 }
 0x497   : > { %v3421_v4 = vand.u32 4294901760, %v3420_v3 }
 0x499   : > { %6908 = vmatmul.mubr.f32.vlgmr.msra.gmra.mrb[8].mxu1 %v3421_v4  ;;  %v4269_v14 = vld [vmem:[%s8373_s17] sm:$0xff] }
 0x49a   : > { %6911 = vmatpush3.msra.mxu1 %v3432_v5  ;;  %6912 = vmatprep.mubr.msk.f32.mxu1 %vm7791_vm0, %v7792_v1 }
 0x49b   : > { %6915 = vmatprep.subr.mxu1 %v7792_v1 }
 0x4a1   : > { %6913 = vmatmul.mubr.f32.vlgmr.msra.gmra.mrb[8].mxu1 %v3417_v59 }
 0x4a2   : > { %6916 = vmatpush3.msra.mxu1 %v3429_v55  ;;  %6917 = vmatprep.mubr.msk.f32.mxu1 %vm7791_vm0, %v7792_v1  ;;  %v5684_v55 = vand.u32 4294901760, %v5663_v53 }
 0x4a3   : > { %6920 = vmatprep.subr.mxu1 %v7792_v1 }
 0x4a4   : > { %v5776_v60 = vsub.f32 %v5663_v53, %v5684_v55 }
 0x4a9   : > { %6918 = vmatmul.mubr.f32.vlgmr.msra.gmra.mrb[8].mxu1 %v3418_v62 }
 0x4aa   : > { %6921 = vmatpush3.msra.mxu1 %v3352_v52  ;;  %6922 = vmatprep.mubr.msk.f32.mxu1 %vm7791_vm0, %v7792_v1 }
 0x4ab   : > { %6925 = vmatprep.subr.mxu1 %v7792_v1 }
 0x4af   : > { %v4265_v6 = vpop.xlane.xlu0 %4264 }
 0x4b0   : > { %7509 = vrcp.f32 %v4265_v6 }
 0x4b1   : > { %6923 = vmatmul.mubr.f32.vlgmr.msra.gmra.mrb[8].mxu1 %v3419_v63 }
 0x4b2   : > { %6926 = vmatpush3.msra.mxu1 %v3430_v61  ;;  %6927 = vmatprep.mubr.msk.f32.mxu1 %vm7791_vm0, %v7792_v1  ;;  %v8478_v61 = vpack.c.bf16 %v5684_v55, %v5681_v54 }
 0x4b3   : > { %6930 = vmatprep.subr.mxu1 %v7792_v1  ;;  %v4274_v7 = vpop.permute.xlu0 %4273 }
 0x4b4   : > { %v4280_v8 = vand.u32 4294901760, %v4274_v7 }
 0x4b6   : > { %v4357_v11 = vsub.f32 %v4274_v7, %v4280_v8 }
 0x4b7   : > { %v5202_v25 = vpop.permute.xlu0 %5201 }
 0x4b8   : > { %v4358_v17 = vand.u32 4294901760, %v4357_v11  ;;  %v5208_v27 = vand.u32 4294901760, %v5202_v25 }
 0x4b9   : > { %6928 = vmatmul.mubr.f32.vlgmr.msra.gmra.mrb[8].mxu1 %v3417_v59 }
 0x4ba   : > { %v7510_v9 = vpop.eup %7509  ;;  %6931 = vmatpush3.msra.mxu1 %v3352_v52  ;;  %6932 = vmatprep.mubr.msk.f32.mxu1 %vm7791_vm0, %v7792_v1  ;;  %v4359_v20 = vsub.f32 %v4357_v11, %v4358_v17  ;;  %v5285_v31 = vsub.f32 %v5202_v25, %v5208_v27  ;;  %v5678_v52 = vand.u32 4294901760, %v5661_v45 }
 0x4bb   : > { %v4268_v10 = vmul.f32 %v7510_v9, %v8377_v38  ;;  %6965 = vmatprep.subr.mxu1 %v7792_v1  ;;  %v5777_v9 = vand.u32 4294901760, %v5776_v60 }
 0x4bc   : > { %v4360_v23 = vand.u32 4294901760, %v4359_v20  ;;  %v5286_v36 = vand.u32 4294901760, %v5285_v31  ;;  %v5762_v58 = vsub.f32 %v5661_v45, %v5678_v52 }
 0x4bd   : > { %v4270_v12 = vmul.f32 0.25, %v4268_v10  ;;  %v4277_v13 = vsel %vm1957_vm2, %v4268_v10, 0 }
 0x4be   : > { %v4345_v15 = vand.u32 4294901760, %v4277_v13  ;;  %v5287_v39 = vsub.f32 %v5285_v31, %v5286_v36  ;;  %v5763_v3 = vand.u32 4294901760, %v5762_v58 }
 0x4bf   : > { %v4271_v16 = vadd.f32 %v4270_v12, %v4269_v14  ;;  %v5778_v12 = vsub.f32 %v5776_v60, %v5777_v9 }
 0x4c0   : > { %v4346_v18 = vsub.f32 %v4277_v13, %v4345_v15  ;;  %v5288_v41 = vand.u32 4294901760, %v5287_v39  ;;  %v5764_v5 = vsub.f32 %v5762_v58, %v5763_v3 }
 0x4c1   : > { %4272 = vst.msk [vmem:[%s8373_s17] sm:$0xff] %vm1957_vm2, %v4271_v16  ;;  %6933 = vmatmul.mubr.f32.vlgmr.msra.gmra.mrb[8].mxu1 %v3417_v59  ;;  %v5769_v59 = vsub.f32 %v5662_v51, %v5681_v54  ;;  %v5779_v14 = vand.u32 4294901760, %v5778_v12 }
 0x4c2   : > { %6966 = vmatpush3.msra.mxu1 %v4280_v8  ;;  %6967 = vmatprep.mubr.msk.f32.mxu1 %vm7791_vm0, %v7792_v1  ;;  %v4347_v19 = vand.u32 4294901760, %v4346_v18  ;;  %v5765_v7 = vand.u32 4294901760, %v5764_v5 }
 0x4c3   : > { %6970 = vmatprep.subr.mxu1 %v7792_v1 }
 0x4c4   : > { %v4348_v21 = vsub.f32 %v4346_v18, %v4347_v19 }
 0x4c6   : > { %v4349_v22 = vand.u32 4294901760, %v4348_v21 }
 0x4c8   : > { %6968 = vmatmul.mubr.f32.vlgmr.msra.gmra.mrb[10].mxu1 %v4349_v22  ;;  %v5197_v32 = vld [vmem:[%s8373_s17] sm:$0xff] }
 0x4c9   : > { %6971 = vmatpush3.msra.mxu1 %v4360_v23  ;;  %6972 = vmatprep.mubr.msk.f32.mxu1 %vm7791_vm0, %v7792_v1 }
 0x4ca   : > { %6975 = vmatprep.subr.mxu1 %v7792_v1 }
 0x4d0   : > { %6973 = vmatmul.mubr.f32.vlgmr.msra.gmra.mrb[10].mxu1 %v4345_v15 }
 0x4d1   : > { %6976 = vmatpush3.msra.mxu1 %v4357_v11  ;;  %6977 = vmatprep.mubr.msk.f32.mxu1 %vm7791_vm0, %v7792_v1 }
 0x4d2   : > { %6980 = vmatprep.subr.mxu1 %v7792_v1 }
 0x4d8   : > { %v5193_v24 = vpop.xlane.xlu1 %5192  ;;  %6978 = vmatmul.mubr.f32.vlgmr.msra.gmra.mrb[10].mxu1 %v4346_v18 }
 0x4d9   : > { %7511 = vrcp.f32 %v5193_v24  ;;  %6981 = vmatpush3.msra.mxu1 %v4280_v8  ;;  %6982 = vmatprep.mubr.msk.f32.mxu1 %vm7791_vm0, %v7792_v1 }
 0x4da   : > { %6985 = vmatprep.subr.mxu1 %v7792_v1 }
 0x4e0   : > { %6983 = vmatmul.mubr.f32.vlgmr.msra.gmra.mrb[10].mxu1 %v4347_v19 }
 0x4e1   : > { %6986 = vmatpush3.msra.mxu1 %v4358_v17  ;;  %6987 = vmatprep.mubr.msk.f32.mxu1 %vm7791_vm0, %v7792_v1  ;;  %v7245_v17 = vpack.c.bf16 %v5776_v60, %v5769_v59 }
 0x4e2   : > { %6990 = vmatprep.subr.mxu1 %v7792_v1 }
 0x4e3   : > { %v7512_v26 = vpop.eup %7511 }
 0x4e4   : > { %v5196_v28 = vmul.f32 %v7512_v26, %v8402_v50  ;;  %v5660_v50 = vld [vmem:[#allocation11] sm:$0xff] }
 0x4e5   : > { %v5675_v49 = vand.u32 4294901760, %v5660_v50 }
 0x4e6   : > { %v5198_v29 = vmul.f32 0.25, %v5196_v28  ;;  %v5205_v30 = vsel %vm1957_vm2, %v5196_v28, 0 }
 0x4e7   : > { %v5273_v33 = vand.u32 4294901760, %v5205_v30  ;;  %v8475_v56 = vpack.c.bf16 %v5678_v52, %v5675_v49  ;;  %v5755_v57 = vsub.f32 %v5660_v50, %v5675_v49 }
 0x4e8   : > { %v5199_v34 = vadd.f32 %v5198_v29, %v5197_v32  ;;  %6988 = vmatmul.mubr.f32.vlgmr.msra.gmra.mrb[10].mxu1 %v4345_v15 }
 0x4e9   : > { %6991 = vmatpush3.msra.mxu1 %v4280_v8  ;;  %6992 = vmatprep.mubr.msk.f32.mxu1 %vm7791_vm0, %v7792_v1  ;;  %v5274_v35 = vsub.f32 %v5205_v30, %v5273_v33  ;;  %v5756_v2 = vand.u32 4294901760, %v5755_v57  ;;  %v5770_v8 = vand.u32 4294901760, %v5769_v59  ;;  %v7242_v16 = vpack.c.bf16 %v5762_v58, %v5755_v57 }
 0x4ea   : > { %5200 = vst.msk [vmem:[%s8373_s17] sm:$0xff] %vm1957_vm2, %v5199_v34  ;;  %7025 = vmatprep.subr.mxu1 %v7792_v1  ;;  %7231 = vmatpush3.bf16.msra.mxu0 %v8475_v56 }
 0x4eb   : > { %v5275_v37 = vand.u32 4294901760, %v5274_v35  ;;  %7232 = vmatprep.subr.bf16.mxu0 %v7790_v0  ;;  %v5757_v4 = vsub.f32 %v5755_v57, %v5756_v2  ;;  %v5771_v11 = vsub.f32 %v5769_v59, %v5770_v8  ;;  %v7254_v19 = vpack.c.bf16 %v5763_v3, %v5756_v2 }
 0x4ec   : > { %v7257_v20 = vpack.c.bf16 %v5777_v9, %v5770_v8 }
 0x4ed   : > { %v5276_v38 = vsub.f32 %v5274_v35, %v5275_v37  ;;  %v5758_v6 = vand.u32 4294901760, %v5757_v4  ;;  %v5772_v13 = vand.u32 4294901760, %v5771_v11 }
 0x4ee   : > { %7234 = vmatpush3.bf16.msra.mxu0 %v8478_v61 }
 0x4ef   : > { %v5277_v40 = vand.u32 4294901760, %v5276_v38  ;;  %7235 = vmatprep.subr.bf16.mxu0 %v7790_v0  ;;  %v7236_v10 = vpack.c.bf16 %v5765_v7, %v5758_v6 }
 0x4f0   : > { %6993 = vmatmul.mubr.f32.vlgmr.msra.gmra.mrb[10].mxu1 %v4345_v15  ;;  %v7239_v15 = vpack.c.bf16 %v5779_v14, %v5772_v13 }
 0x4f1   : > { %7026 = vmatpush3.msra.mxu1 %v5208_v27  ;;  %7027 = vmatprep.mubr.msk.f32.mxu1 %vm7791_vm0, %v7792_v1 }
 0x4f2   : > { %7030 = vmatprep.subr.mxu1 %v7792_v1 }
 0x4f4   : > { %7028 = vmatmul.mubr.f32.vlgmr.msra.gmra.mrb[12].mxu1 %v5277_v40 }
 0x4f5   : > { %7031 = vmatpush3.msra.mxu1 %v5288_v41  ;;  %7032 = vmatprep.mubr.msk.f32.mxu1 %vm7791_vm0, %v7792_v1 }
 0x4f6   : > { %7035 = vmatprep.subr.mxu1 %v7792_v1 }
 0x4fc   : > { %7033 = vmatmul.mubr.f32.vlgmr.msra.gmra.mrb[12].mxu1 %v5273_v33 }
 0x4fd   : > { %7036 = vmatpush3.msra.mxu1 %v5285_v31  ;;  %7037 = vmatprep.mubr.msk.f32.mxu1 %vm7791_vm0, %v7792_v1 }
 0x4fe   : > { %7040 = vmatprep.subr.mxu1 %v7792_v1 }
 0x504   : > { %7038 = vmatmul.mubr.f32.vlgmr.msra.gmra.mrb[12].mxu1 %v5274_v35 }
 0x505   : > { %7041 = vmatpush3.msra.mxu1 %v5208_v27  ;;  %7042 = vmatprep.mubr.msk.f32.mxu1 %vm7791_vm0, %v7792_v1 }
 0x506   : > { %7045 = vmatprep.subr.mxu1 %v7792_v1 }
 0x50c   : > { %7043 = vmatmul.mubr.f32.vlgmr.msra.gmra.mrb[12].mxu1 %v5275_v37 }
 0x50d   : > { %7046 = vmatpush3.msra.mxu1 %v5286_v36  ;;  %7047 = vmatprep.mubr.msk.f32.mxu1 %vm7791_vm0, %v7792_v1 }
 0x50e   : > { %7050 = vmatprep.subr.mxu1 %v7792_v1 }
 0x514   : > { %7048 = vmatmul.mubr.f32.vlgmr.msra.gmra.mrb[12].mxu1 %v5273_v33 }
 0x515   : > { %7051 = vmatpush3.msra.mxu1 %v5208_v27  ;;  %7052 = vmatprep.mubr.msk.f32.mxu1 %vm7791_vm0, %v7792_v1 }
 0x51c   : > { %7053 = vmatmul.mubr.f32.vlgmr.msra.gmra.mrb[12].mxu1 %v5273_v33 }
 0x521   : > { %v2869_v42 = vpop.f32.mrb[6].mxu1 }
 0x522   : > { %2873 = vst.msk [vmem:[#allocation2] sm:$0xff] %vm1957_vm2, %v2869_v42  ;;  %v6874_v43 = vpop.f32.mrb[7].mxu1 }
 0x594   : > { %v3793_v44 = vpop.f32.mrb[8].mxu1 }
 0x595   : > { %3798 = vrot.lane.b32.xlu0 %v3793_v44, %s7796_s20  ;;  %v6934_v46 = vpop.f32.mrb[9].mxu1 }
 0x5c3   : > { %v4721_v47 = vpop.f32.mrb[10].mxu1 }
 0x5c4   : > { %4726 = vrot.lane.b32.xlu0 %v4721_v47, %s7797_s16  ;;  %v6994_v48 = vpop.f32.mrb[11].mxu1 }
 0x5ef   : > { %v5649_v62 = vpop.f32.mrb[12].mxu1 }
 0x5f0   : > { %5654 = vrot.lane.b32.xlu0 %v5649_v62, %s7798_s9  ;;  %v7054_v63 = vpop.f32.mrb[13].mxu1 }
 0x607   : > { %v3799_v18 = vpop.permute.xlu0 %3798 }
 0x608   : > { %3802 = vst.msk [vmem:[#allocation2] sm:$0xff] %vm3801_vm3, %v3799_v18 }
 0x636   : > { %v4727_v21 = vpop.permute.xlu0 %4726 }
 0x637   : > { %4730 = vst.msk [vmem:[#allocation2] sm:$0xff] %vm4729_vm4, %v4727_v21 }
 0x662   : > { %v5655_v22 = vpop.permute.xlu0 %5654 }
 0x663   : > { %5658 = vst.msk [vmem:[#allocation2] sm:$0xff] %vm5657_vm5, %v5655_v22 }
 0x66a   : > { %v5659_v23 = vld [vmem:[#allocation2] sm:$0xff] }
 0x66b   : > { %v5672_v24 = vsel %vm465_vm1, %v5659_v23, 0 }
 0x66c   : > { %v5743_v25 = vand.u32 4294901760, %v5672_v24 }
 0x66e   : > { %v5744_v26 = vsub.f32 %v5672_v24, %v5743_v25 }
 0x670   : > { %v5745_v27 = vand.u32 4294901760, %v5744_v26 }
 0x672   : > { %v5746_v28 = vsub.f32 %v5744_v26, %v5745_v27 }
 0x674   : > { %v5747_v29 = vand.u32 4294901760, %v5746_v28 }
 0x676   : > { %7064 = vmatmul.mubr.f32.vlgmr.msra.gmra.mrb[10].mxu0 %v5747_v29 }
 0x677   : > { %7237 = vmatpush3.bf16.msra.mxu0 %v7236_v10  ;;  %7074 = vmatprep.mubr.msk.f32.mxu0 %vm7791_vm0, %v7792_v1 }
 0x678   : > { %7238 = vmatprep.subr.bf16.mxu0 %v7790_v0 }
 0x67b   : > { %7240 = vmatpush3.bf16.msra.mxu0 %v7239_v15 }
 0x67c   : > { %7241 = vmatprep.subr.bf16.mxu0 %v7790_v0 }
 0x67e   : > { %7075 = vmatmul.mubr.f32.vlgmr.msra.gmra.mrb[10].mxu0 %v5743_v25 }
 0x67f   : > { %7243 = vmatpush3.bf16.msra.mxu0 %v7242_v16  ;;  %7085 = vmatprep.mubr.msk.f32.mxu0 %vm7791_vm0, %v7792_v1 }
 0x680   : > { %7244 = vmatprep.subr.bf16.mxu0 %v7790_v0 }
 0x683   : > { %7246 = vmatpush3.bf16.msra.mxu0 %v7245_v17 }
 0x684   : > { %7247 = vmatprep.subr.bf16.mxu0 %v7790_v0 }
 0x686   : > { %7086 = vmatmul.mubr.f32.vlgmr.msra.gmra.mrb[10].mxu0 %v5744_v26 }
 0x687   : > { %7249 = vmatpush3.bf16.msra.mxu0 %v8475_v56  ;;  %7096 = vmatprep.mubr.msk.f32.mxu0 %vm7791_vm0, %v7792_v1 }
 0x688   : > { %7250 = vmatprep.subr.bf16.mxu0 %v7790_v0 }
 0x68b   : > { %7252 = vmatpush3.bf16.msra.mxu0 %v8478_v61 }
 0x68c   : > { %7253 = vmatprep.subr.bf16.mxu0 %v7790_v0 }
 0x68e   : > { %7097 = vmatmul.mubr.f32.vlgmr.msra.gmra.mrb[10].mxu0 %v5745_v27 }
 0x68f   : > { %7255 = vmatpush3.bf16.msra.mxu0 %v7254_v19  ;;  %7107 = vmatprep.mubr.msk.f32.mxu0 %vm7791_vm0, %v7792_v1 }
 0x690   : > { %7256 = vmatprep.subr.bf16.mxu0 %v7790_v0 }
 0x693   : > { %7258 = vmatpush3.bf16.msra.mxu0 %v7257_v20 }
 0x694   : > { %7259 = vmatprep.subr.bf16.mxu0 %v7790_v0 }
 0x696   : > { %7108 = vmatmul.mubr.f32.vlgmr.msra.gmra.mrb[10].mxu0 %v5743_v25 }
 0x697   : > { %7261 = vmatpush3.bf16.msra.mxu0 %v8475_v56  ;;  %7118 = vmatprep.mubr.msk.f32.mxu0 %vm7791_vm0, %v7792_v1 }
 0x698   : > { %7262 = vmatprep.subr.bf16.mxu0 %v7790_v0 }
 0x69b   : > { %7264 = vmatpush3.bf16.msra.mxu0 %v8478_v61 }
 0x69e   : > { %7119 = vmatmul.mubr.f32.vlgmr.msra.gmra.mrb[10].mxu0 %v5743_v25 }
 0x69f   : > { %7672 = shalt.err (!%p7669_p8)
}
 0x6a0   : > { %s7673_s14 = scalar_lea.hbm %s8513_s21, 128  ;;  %s7677_s12 = scalar_lea.hbm %s8601_s8, 256 }
 0x6a1   : > { %p7674_p0 = scmp.ne.s32.totalorder %s8513_s21, %s7673_s14  ;;  %p7678_p7 = scmp.lt.u32.totalorder %s8513_s21, %s8601_s8 }
 0x6a2   : > { %p7679_p13 = scmp.lt.u32.totalorder %s7677_s12, %s7673_s14  ;;  %p7681_p2 = scmp.lt.u32.totalorder %s7673_s14, %s8513_s21 }
 0x6a3   : > { %p7675_p5 = pnand %p7674_p0, %p8655_p4 }
 0x6a4   : > { %p7680_p9 = por %p7679_p13, %p7678_p7 }
 0x6a5   : > { %p7676_p12 = pneg %p7675_p5 }
 0x6a6   : > { %p7682_p1 = por %p7681_p2, %p7680_p9 }
 0x6a8   : > { %p7683_p3 = pnand %p7682_p1, %p7676_p12 }
 0x6aa   : > { %7686 = shalt.err (!%p7683_p3)
}
 0x6ab   : > { %7403 = dma.vmem_to_hbm [thread:$0]  (%p8655_p4), %s6195_s22, 128, %s8513_s21, %s6166_s27   ;;  %v6394_v0 = vld [vmem:[%s8599_s6] ss:$0 sm:$0xff] }
 0x6ac   : > { %s443_s9 = scalar_lea.vmem [#allocation12], %s8094_s19  ;;  %s8543_s13 = scalar_lea.hbm %s8600_s7, %s6397_s5 }
 0x6ad   : > { %s6180_s10 = sshll.u32 %s443_s9, 4  ;;  %s6161_s21 = scalar_lea.sflag [#allocation5], %s8091_s3  ;;  %s8545_s10 = int_to_ptr.vmem [resolvable:$true] %s6180_s10 }
 0x6ae   : > { %s7687_s22 = scalar_lea.vmem %s8545_s10, 128  ;;  %s7800_s19 = smov [#allocation12]  }
 0x6af   : > { %p7688_p11 = scmp.ne.s32.totalorder %s8545_s10, %s7687_s22  ;;  %s7691_s30 = sshll.u32 %s7800_s19, 4  ;;  %s7692_s30 = int_to_ptr.vmem [resolvable:$false] %s7691_s30 }
 0x6b0   : > { %s7693_s27 = scalar_lea.vmem %s7692_s30, 256  ;;  %p7694_p8 = scmp.lt.s32.totalorder %s8545_s10, %s7692_s30 }
 0x6b1   : > { %p7689_p10 = pnand %p7688_p11, %p8655_p4  ;;  %p7695_p0 = scmp.lt.s32.totalorder %s7693_s27, %s7687_s22 }
 0x6b3   : > { %p7690_p6 = pneg %p7689_p10  ;;  %p7696_p5 = por %p7695_p0, %p7694_p8 }
 0x6b5   : > { %p7697_p12 = pnand %p7696_p5, %p7690_p6 }
 0x771   : > { %v6155_v1 = vpop.f32.mrb[10].mxu0 }
 0x772   : > { %v7269_v30 = vadd.f32 %v6394_v0, %v6155_v1  ;;  %v7120_v31 = vpop.f32.mrb[11].mxu0 }
 0x774   : > { %6159 = vst.msk [vmem:[%s443_s9] sm:$0xff] %vm465_vm1, %v7269_v30 }
 0x775   : > { %7700 = shalt.err (!%p7697_p12)
}
 0x776   : > { %s7701_s3 = scalar_lea.hbm %s8543_s13, 128  ;;  %s7705_s25 = scalar_lea.hbm %s8600_s7, 256 }
 0x777   : > { %p7702_p7 = scmp.ne.s32.totalorder %s8543_s13, %s7701_s3  ;;  %p7706_p2 = scmp.lt.u32.totalorder %s8543_s13, %s8600_s7 }
 0x778   : > { %p7707_p1 = scmp.lt.u32.totalorder %s7705_s25, %s7701_s3  ;;  %p7709_p11 = scmp.lt.u32.totalorder %s7701_s3, %s8543_s13 }
 0x779   : > { %p7703_p13 = pnand %p7702_p7, %p8655_p4 }
 0x77a   : > { %p7708_p3 = por %p7707_p1, %p7706_p2 }
 0x77b   : > { %p7704_p9 = pneg %p7703_p13 }
 0x77c   : > { %p7710_p10 = por %p7709_p11, %p7708_p3 }
 0x77e   : > { %p7711_p6 = pnand %p7710_p10, %p7704_p9 }
 0x780   : > { %7714 = shalt.err (!%p7711_p6)
}
 0x781   : > { %7402 = dma.vmem_to_hbm [thread:$0]  (%p8655_p4), %s8545_s10, 128, %s8543_s13, %s6161_s21  }
 0x782 PF: > { %s8656_s18 = sld [smem:[#allocation20_spill]]  ;;  %s8657_s12 = sld [smem:[#allocation23_spill]] }
 0x783   : > { %s8658_s26 = sld [smem:[#allocation22_spill]] }
 0x788   : > { %s6206_s17 = sand.u32 1, %s8656_s18   ;;  %p8659_p8 = scmp.ne.s32.totalorder %s8657_s12, 0 }
 0x789   : > { %p8660_p0 = scmp.ge.s32.totalorder %s8658_s26, 2  ;;  %s6207_s20 = scalar_lea.sflag [#allocation5], %s6206_s17 }
 0x78b   : > { %p7424_p5 = pnand %p8660_p0, %p8659_p8 }
 0x78d   : > { %7752 = dma.done.wait (!%p7424_p5), %s6207_s20, 128  }
 0x78e   : > { %7754 = vsyncadd (!%p7424_p5), %s6207_s20, 4294967168  ;;  %s6216_s16 = scalar_lea.sflag [#allocation14], %s6206_s17 }
 0x78f   : > { %7756 = dma.done.wait (!%p7424_p5), %s6216_s16, 128  }
 0x790   : > { %7758 = vsyncadd (!%p7424_p5), %s6216_s16, 4294967168  ;;  %s32_s10 = sadd.s32 1, %s8658_s26   ;;  %s8661_s24 = sld [smem:[#allocation25_spill]] }
 0x791   : > { %p29_p12 = scmp.ge.s32.totalorder %s32_s10, 4   ;;  %s8662_s30 = sld [smem:[#allocation21_spill]] }
 0x792   : > { %s8663_s9 = sld [smem:[#allocation24_spill]]  ;;  %s8664_s27 = smov %s7765_s28 }
 0x793   : > { %s8665_s28 = smov %s7769_s29  ;;  %31 = sbr.rel (!%p29_p12) target bundleno = 15 (0xf), region = 146 }
 0x796   : > { %s8666_s29 = smov %s8661_s24 }
 0x79a   :  { %6221 = vsyncpa [#allocation4], 1 }
 0x79b   :  { %6223 = vsyncpa [#allocation4 + $0x1], 1 }
 0x79c   :  { %6224 = vsyncpa [#allocation7], 1 }
 0x79d   :  { %6226 = vsyncpa [#allocation7 + $0x1], 1 }
 0x79e   :  { %6227 = vsyncpa [#allocation10], 1 }
 0x79f   :  { %6228 = vsyncpa [#allocation5], 1 }
 0x7a0   :  { %6230 = vsyncpa [#allocation5 + $0x1], 1 }
 0x7a1   :  { %6231 = vsyncpa [#allocation14], 1 }
 0x7a2   :  { %6233 = vsyncpa [#allocation14 + $0x1], 1 }

</bundles_post_ra>
